<compile_context>
chip_gen: v7x
topology: tpu7x:2x2x1
jax: 0.10.0
libtpu: 0.0.40
codegen_flags: <defaults>
</compile_context>

<pallas_src>
import functools
import math

import jax
import jax.numpy as jnp
from jax.experimental import pallas as pl
from jax.experimental.pallas import tpu as pltpu

LEAKY_SLOPE = 0.01                    # nn.LeakyReLU default negative_slope
LOG_MASK_EPS = math.log(1e-45)        # torch's (mask + 1e-45).log() for mask==0


# ----------------------------------------------------------------------------
# Host-side parameter packing
# ----------------------------------------------------------------------------
def _block_diag(ws):
    rows = sum(w.shape[0] for w in ws)
    cols = sum(w.shape[1] for w in ws)
    out = jnp.zeros((rows, cols), jnp.float32)
    r = c = 0
    for w in ws:
        out = out.at[r:r + w.shape[0], c:c + w.shape[1]].set(w)
        r += w.shape[0]
        c += w.shape[1]
    return out


def _fuse_group(per_graph_layers):
    """Fuse G independent FCNs into one FCN with block-diagonal weights."""
    depth = len(per_graph_layers[0])
    fused = []
    for i in range(depth):
        w = _block_diag([g[i][0] for g in per_graph_layers])
        b = jnp.concatenate([g[i][1] for g in per_graph_layers], axis=0)
        fused.append((w, b))
    return fused


def _pack_slab(groups):
    """Pack all (w, b) layers into one [R, C] f32 slab.

    Each layer occupies an 8-row-aligned block: rows [0:n_in] = weight,
    row n_in = bias, columns [0:n_out]; C is 128-lane padded.
    Returns (slab, metas) where metas[group][layer] = (row_off, n_in, n_out).
    """
    max_out = max(w.shape[1] for grp in groups for (w, _) in grp)
    cols = ((max_out + 127) // 128) * 128
    blocks, metas, r = [], [], 0
    for grp in groups:
        gmeta = []
        for (w, b) in grp:
            n_in, n_out = w.shape
            rows_pad = ((n_in + 1 + 7) // 8) * 8
            blk = jnp.zeros((rows_pad, cols), jnp.float32)
            blk = blk.at[:n_in, :n_out].set(w)
            blk = blk.at[n_in, :n_out].set(b)
            blocks.append(blk)
            gmeta.append((r, n_in, n_out))
            r += rows_pad
        metas.append(tuple(gmeta))
    return jnp.concatenate(blocks, axis=0), metas


# ----------------------------------------------------------------------------
# In-kernel FCN on the packed slab
# ----------------------------------------------------------------------------
def _apply_fcn(slab_ref, x, gmeta, final_layer_act=True):
    n = len(gmeta)
    for i, (r0, n_in, n_out) in enumerate(gmeta):
        w = slab_ref[pl.ds(r0, n_in), pl.ds(0, n_out)]
        b = slab_ref[pl.ds(r0 + n_in, 1), pl.ds(0, n_out)]
        x = jnp.dot(x, w, preferred_element_type=jnp.float32) + b
        if i < n - 1 or final_layer_act:
            x = jnp.maximum(x, LEAKY_SLOPE * x)
    return x


# ----------------------------------------------------------------------------
# Fused forward pass: one pallas_call for the whole policy network
# ----------------------------------------------------------------------------
def policy_forward(params, node_feats, adj_mats, mask, *,
                   n_switches, n_steps, batch_block=None):
    G = len(node_feats)
    B, N = node_feats[0].shape[0], node_feats[0].shape[1]
    S = n_switches
    S1 = S + 1

    mgcn = params["mgcn"]
    HS = mgcn["feat"][0][-1][0].shape[1]          # h_size
    NOUT = mgcn["merge"][-1][0].shape[1]          # n_output
    GH = G * HS

    # --- pack everything host-side ---
    groups = [_fuse_group(mgcn["feat"]), _fuse_group(mgcn["msg"]),
              mgcn["merge"], params["f_gcn_out"],
              params["priority"], params["agg_priority"]]
    slab, metas = _pack_slab(groups)
    feat_meta, msg_meta, merge_meta, fout_meta, prio_meta, aggp_meta = metas

    node_cat = jnp.concatenate(node_feats, axis=-1)        # [B, N, sum F_g]
    adj_stack = jnp.stack(adj_mats, axis=1)                # [B, G, N, N]
    mask3 = mask.astype(jnp.float32).reshape(B, S1, 1)     # [B, S+1, 1]
    F_total = node_cat.shape[-1]

    if batch_block is None or B % batch_block != 0:
        batch_block = B                                    # fold whole batch
    Bt = batch_block
    n_blocks = B // Bt

    def kernel(node_ref, adj_ref, mask_ref, slab_ref, out_ref):
        fcn = functools.partial(_apply_fcn, slab_ref)

        # ---- BatchMGCN (per-graph FCNs fused via block-diagonal weights) ----
        x = node_ref[...].reshape(Bt * N, F_total)         # batch on sublanes
        h = fcn(x, feat_meta)                              # [Bt*N, G*h_size]
        adj = adj_ref[...]                                 # [Bt, G, N, N]
        # NOTE: switch to lax.fori_loop(..., unroll=True) if n_steps grows.
        for _ in range(n_steps):
            msg = fcn(h, msg_meta)                         # [Bt*N, G*h_size]
            msg3 = msg.reshape(Bt, N, GH)
            deltas = [
                jnp.einsum("bij,bjh->bih", adj[:, g],
                           msg3[:, :, g * HS:(g + 1) * HS],
                           preferred_element_type=jnp.float32)
                for g in range(G)
            ]
            h = h + jnp.concatenate(deltas, axis=-1).reshape(Bt * N, GH)

        gcn_out = fcn(h, merge_meta)                       # [Bt*N, n_output]

        # ---- policy heads ----
        # torch gather with switch_idx[:, i, :] = i  <=> first n_switches rows
        if S == N:
            sw_in = gcn_out
        else:
            sw_in = jnp.concatenate(
                [gcn_out[b * N:b * N + S, :] for b in range(Bt)], axis=0)
        sw = fcn(sw_in, fout_meta)                         # [Bt*S, n_output]
        sp = fcn(sw, prio_meta, final_layer_act=False)     # [Bt*S, 1]

        # per-batch-element tail (tiny 2-D ops; single merged output store)
        for b in range(Bt):
            sw_b = sw[b * S:(b + 1) * S, :]                # [S, n_output]
            sp_b = sp[b * S:(b + 1) * S, :]                # [S, 1]
            agg_b = jnp.sum(sw_b, axis=0, keepdims=True)   # [1, n_output]
            tp_b = fcn(agg_b, aggp_meta, final_layer_act=False)   # [1, 1]
            pv = jnp.concatenate([sp_b, tp_b], axis=0)     # [S+1, 1]

            m = jnp.max(pv, axis=0, keepdims=True)
            z = pv - m
            lse = jnp.log(jnp.sum(jnp.exp(z), axis=0, keepdims=True))
            log_pi = z - lse
            pi = jnp.exp(log_pi)

            msk = mask_ref[b]                              # [S+1, 1]
            log_mask = jnp.where(msk > 0.5, jnp.float32(0.0),
                                 jnp.float32(LOG_MASK_EPS))
            pvm = pv + log_mask
            m2 = jnp.max(pvm, axis=0, keepdims=True)
            z2 = pvm - m2
            lse2 = jnp.log(jnp.sum(jnp.exp(z2), axis=0, keepdims=True))
            mlog_pi = z2 - lse2
            mpi = jnp.exp(mlog_pi)

            out_ref[b] = jnp.concatenate([log_pi, pi, mlog_pi, mpi], axis=-1)

    out = pl.pallas_call(
        kernel,
        grid=(n_blocks,),
        in_specs=[
            pl.BlockSpec((Bt, N, F_total), lambda i: (i, 0, 0)),
            pl.BlockSpec((Bt, G, N, N), lambda i: (i, 0, 0, 0)),
            pl.BlockSpec((Bt, S1, 1), lambda i: (i, 0, 0)),
            pl.BlockSpec(slab.shape, lambda i: (0, 0)),     # resident weights
        ],
        out_specs=pl.BlockSpec((Bt, S1, 4), lambda i: (i, 0, 0)),
        out_shape=jax.ShapeDtypeStruct((B, S1, 4), jnp.float32),
        compiler_params=pltpu.CompilerParams(
            dimension_semantics=("parallel",)),
    )(node_cat, adj_stack, mask3, slab)

    return out[:, :, 0], out[:, :, 1], out[:, :, 2], out[:, :, 3]


# ----------------------------------------------------------------------------
# Parameter init (deterministic, in-script)
# ----------------------------------------------------------------------------
def init_fcn(key, n_in, n_hids, n_out):
    sizes = [n_in] + list(n_hids) + [n_out]
    layers = []
    for i in range(len(sizes) - 1):
        key, kw, kb = jax.random.split(key, 3)
        w = jax.random.normal(kw, (sizes[i], sizes[i + 1]), jnp.float32)
        w = w / jnp.sqrt(jnp.float32(sizes[i]))
        b = 0.01 * jax.random.normal(kb, (sizes[i + 1],), jnp.float32)
        layers.append((w, b))
    return key, layers


def init_policy(key, n_feats, n_output, n_hids, h_size):
    mgcn = {"feat": [], "msg": []}
    for f in n_feats:
        key, p = init_fcn(key, f, n_hids, h_size)
        mgcn["feat"].append(p)
        key, p = init_fcn(key, h_size, n_hids, h_size)
        mgcn["msg"].append(p)
    key, mgcn["merge"] = init_fcn(key, h_size * len(n_feats), n_hids, n_output)
    params = {"mgcn": mgcn}
    key, params["f_gcn_out"] = init_fcn(key, n_output, n_hids, n_output)
    key, params["priority"] = init_fcn(key, n_output, n_hids, 1)
    key, params["agg_priority"] = init_fcn(key, n_output, n_hids, 1)
    return params


# ----------------------------------------------------------------------------
# Pure-JAX reference (for correctness check only)
# ----------------------------------------------------------------------------
def _ref_forward(params, node_feats, adj_mats, mask, *, n_switches, n_steps):
    def fcn(x, layers, final_layer_act=True):
        n = len(layers)
        for i, (w, b) in enumerate(layers):
            x = x @ w + b
            if i < n - 1 or final_layer_act:
                x = jnp.where(x > 0, x, LEAKY_SLOPE * x)
        return x

    mgcn = params["mgcn"]
    hs = []
    for g in range(len(node_feats)):
        h = fcn(node_feats[g], mgcn["feat"][g])
        for _ in range(n_steps):
            msg = fcn(h, mgcn["msg"][g])
            h = h + jnp.einsum("bij,bjd->bid", adj_mats[g], msg)
        hs.append(h)
    gcn_out = fcn(jnp.concatenate(hs, axis=-1), mgcn["merge"])
    switch_out = gcn_out[:, :n_switches, :]
    switch_out = fcn(switch_out, params["f_gcn_out"])
    sp = fcn(switch_out, params["priority"], final_layer_act=False)[..., 0]
    agg = jnp.sum(switch_out, axis=1)
    tp = fcn(agg, params["agg_priority"], final_layer_act=False)
    pv = jnp.concatenate([sp, tp], axis=1)
    log_pi = jax.nn.log_softmax(pv, axis=-1)
    log_mask = jnp.where(mask > 0.5, 0.0, LOG_MASK_EPS)
    mlog_pi = jax.nn.log_softmax(pv + log_mask, axis=-1)
    return log_pi, jnp.exp(log_pi), mlog_pi, jnp.exp(mlog_pi)


# ----------------------------------------------------------------------------
if __name__ == "__main__":
    batch = 2
    n_switches = 8
    n_nodes = 8            # number of graph nodes (>= n_switches)
    n_feats = [4, 6]       # per-graph node feature sizes (2 graphs)
    n_output = 16
    n_hids = [32]
    h_size = 16
    n_steps = 2

    key = jax.random.PRNGKey(0)
    key, kp = jax.random.split(key)
    params = init_policy(kp, n_feats, n_output, n_hids, h_size)

    node_feats = []
    adj_mats = []
    for f in n_feats:
        key, k1, k2 = jax.random.split(key, 3)
        node_feats.append(jax.random.normal(k1, (batch, n_nodes, f), jnp.float32))
        adj = jax.random.uniform(k2, (batch, n_nodes, n_nodes), jnp.float32)
        adj = adj / jnp.sum(adj, axis=-1, keepdims=True)     # row-normalized
        adj_mats.append(adj)

    key, km = jax.random.split(key)
    mask = (jax.random.uniform(km, (batch, n_switches + 1)) > 0.3)
    mask = mask.at[:, -1].set(True).astype(jnp.float32)      # terminal always valid

    fwd = jax.jit(functools.partial(policy_forward,
                                    n_switches=n_switches, n_steps=n_steps))
    outs = fwd(params, node_feats, adj_mats, mask)
    jax.block_until_ready(outs)
    log_pi, pi, masked_log_pi, masked_pi = outs

    assert log_pi.shape == (batch, n_switches + 1)
    assert pi.shape == (batch, n_switches + 1)
    assert masked_log_pi.shape == (batch, n_switches + 1)
    assert masked_pi.shape == (batch, n_switches + 1)

    # correctness vs. pure-JAX reference
    ref = _ref_forward(params, node_feats, adj_mats, mask,
                       n_switches=n_switches, n_steps=n_steps)
    for got, want in zip(outs, ref):
        assert jnp.allclose(got, want, atol=2e-3, rtol=2e-3)
    assert bool(jnp.all(jnp.isfinite(log_pi)))
    assert jnp.allclose(jnp.sum(pi, axis=-1), 1.0, atol=1e-3)
    assert jnp.allclose(jnp.sum(masked_pi, axis=-1), 1.0, atol=1e-3)

    print("KERNEL_OK")
</pallas_src>

<mosaic_0001>
module attributes {stable_mosaic.version = 11 : i64} {
  func.func @kernel(%arg0: i32, %arg1: memref<2x8x10xf32, #tpu.memory_space<vmem>>, %arg2: memref<2x2x8x8xf32, #tpu.memory_space<vmem>>, %arg3: memref<2x9x1xf32, #tpu.memory_space<vmem>>, %arg4: memref<472x128xf32, #tpu.memory_space<vmem>>, %arg5: memref<2x9x4xf32, #tpu.memory_space<vmem>>) attributes {dimension_semantics = [#tpu.dimension_semantics<parallel>], iteration_bounds = array<i64: 1>, scalar_prefetch = 0 : i64, scratch_operands = 0 : i64, tpu.core_type = #tpu.core_type<tc>, window_params = [{transform_indices = @transform_0, window_bounds = array<i64: 2, 8, 10>}, {transform_indices = @transform_1, window_bounds = array<i64: 2, 2, 8, 8>}, {transform_indices = @transform_2, window_bounds = array<i64: 2, 9, 1>}, {pipeline_mode = #tpu.pipeline_mode<synchronous>, transform_indices = @transform_3, window_bounds = array<i64: 472, 128>}, {transform_indices = @transform_4, window_bounds = array<i64: 2, 9, 4>}]} {
    %c0 = arith.constant 0 : index
    %c0_0 = arith.constant 0 : index
    %c0_1 = arith.constant 0 : index
    %0 = vector.load %arg1[%c0, %c0_0, %c0_1] : memref<2x8x10xf32, #tpu.memory_space<vmem>>, vector<2x8x10xf32>
    %1 = vector.shape_cast %0 : vector<2x8x10xf32> to vector<16x10xf32>
    %c0_2 = arith.constant 0 : index
    %c0_3 = arith.constant 0 : index
    %2 = vector.load %arg4[%c0_2, %c0_3] : memref<472x128xf32, #tpu.memory_space<vmem>>, vector<10x64xf32>
    %c10 = arith.constant 10 : index
    %c0_4 = arith.constant 0 : index
    %3 = vector.load %arg4[%c10, %c0_4] : memref<472x128xf32, #tpu.memory_space<vmem>>, vector<1x64xf32>
    %cst = arith.constant dense<0.000000e+00> : vector<16x64xf32>
    %4 = tpu.matmul %1, %2, %cst {dimension_numbers = #tpu.dot_dimension_numbers<[1], [0], [0], [1], [0, 0, 1, 1], [], []>} : vector<16x10xf32>, vector<10x64xf32>, vector<16x64xf32> -> vector<16x64xf32>
    %5 = vector.broadcast %3 : vector<1x64xf32> to vector<16x64xf32>
    %6 = arith.addf %4, %5 : vector<16x64xf32>
    %cst_5 = arith.constant 0.00999999977 : f32
    %7 = vector.broadcast %cst_5 : f32 to vector<16x64xf32>
    %8 = arith.mulf %7, %6 : vector<16x64xf32>
    %9 = arith.maximumf %6, %8 : vector<16x64xf32>
    %c16 = arith.constant 16 : index
    %c0_6 = arith.constant 0 : index
    %10 = vector.load %arg4[%c16, %c0_6] : memref<472x128xf32, #tpu.memory_space<vmem>>, vector<64x32xf32>
    %c80 = arith.constant 80 : index
    %c0_7 = arith.constant 0 : index
    %11 = vector.load %arg4[%c80, %c0_7] : memref<472x128xf32, #tpu.memory_space<vmem>>, vector<1x32xf32>
    %cst_8 = arith.constant dense<0.000000e+00> : vector<16x32xf32>
    %12 = tpu.matmul %9, %10, %cst_8 {dimension_numbers = #tpu.dot_dimension_numbers<[1], [0], [0], [1], [0, 0, 1, 1], [], []>} : vector<16x64xf32>, vector<64x32xf32>, vector<16x32xf32> -> vector<16x32xf32>
    %13 = vector.broadcast %11 : vector<1x32xf32> to vector<16x32xf32>
    %14 = arith.addf %12, %13 : vector<16x32xf32>
    %cst_9 = arith.constant 0.00999999977 : f32
    %15 = vector.broadcast %cst_9 : f32 to vector<16x32xf32>
    %16 = arith.mulf %15, %14 : vector<16x32xf32>
    %17 = arith.maximumf %14, %16 : vector<16x32xf32>
    %c0_10 = arith.constant 0 : index
    %c0_11 = arith.constant 0 : index
    %c0_12 = arith.constant 0 : index
    %c0_13 = arith.constant 0 : index
    %18 = vector.load %arg2[%c0_10, %c0_11, %c0_12, %c0_13] : memref<2x2x8x8xf32, #tpu.memory_space<vmem>>, vector<2x2x8x8xf32>
    %c88 = arith.constant 88 : index
    %c0_14 = arith.constant 0 : index
    %19 = vector.load %arg4[%c88, %c0_14] : memref<472x128xf32, #tpu.memory_space<vmem>>, vector<32x64xf32>
    %c120 = arith.constant 120 : index
    %c0_15 = arith.constant 0 : index
    %20 = vector.load %arg4[%c120, %c0_15] : memref<472x128xf32, #tpu.memory_space<vmem>>, vector<1x64xf32>
    %cst_16 = arith.constant dense<0.000000e+00> : vector<16x64xf32>
    %21 = tpu.matmul %17, %19, %cst_16 {dimension_numbers = #tpu.dot_dimension_numbers<[1], [0], [0], [1], [0, 0, 1, 1], [], []>} : vector<16x32xf32>, vector<32x64xf32>, vector<16x64xf32> -> vector<16x64xf32>
    %22 = vector.broadcast %20 : vector<1x64xf32> to vector<16x64xf32>
    %23 = arith.addf %21, %22 : vector<16x64xf32>
    %cst_17 = arith.constant 0.00999999977 : f32
    %24 = vector.broadcast %cst_17 : f32 to vector<16x64xf32>
    %25 = arith.mulf %24, %23 : vector<16x64xf32>
    %26 = arith.maximumf %23, %25 : vector<16x64xf32>
    %c128 = arith.constant 128 : index
    %c0_18 = arith.constant 0 : index
    %27 = vector.load %arg4[%c128, %c0_18] : memref<472x128xf32, #tpu.memory_space<vmem>>, vector<64x32xf32>
    %c192 = arith.constant 192 : index
    %c0_19 = arith.constant 0 : index
    %28 = vector.load %arg4[%c192, %c0_19] : memref<472x128xf32, #tpu.memory_space<vmem>>, vector<1x32xf32>
    %cst_20 = arith.constant dense<0.000000e+00> : vector<16x32xf32>
    %29 = tpu.matmul %26, %27, %cst_20 {dimension_numbers = #tpu.dot_dimension_numbers<[1], [0], [0], [1], [0, 0, 1, 1], [], []>} : vector<16x64xf32>, vector<64x32xf32>, vector<16x32xf32> -> vector<16x32xf32>
    %30 = vector.broadcast %28 : vector<1x32xf32> to vector<16x32xf32>
    %31 = arith.addf %29, %30 : vector<16x32xf32>
    %cst_21 = arith.constant 0.00999999977 : f32
    %32 = vector.broadcast %cst_21 : f32 to vector<16x32xf32>
    %33 = arith.mulf %32, %31 : vector<16x32xf32>
    %34 = arith.maximumf %31, %33 : vector<16x32xf32>
    %35 = vector.shape_cast %34 : vector<16x32xf32> to vector<2x8x32xf32>
    %36 = vector.extract_strided_slice %18 {offsets = [0, 0, 0, 0], sizes = [2, 1, 8, 8], strides = [1, 1, 1, 1]} : vector<2x2x8x8xf32> to vector<2x1x8x8xf32>
    %37 = vector.shape_cast %36 : vector<2x1x8x8xf32> to vector<2x8x8xf32>
    %38 = vector.extract_strided_slice %35 {offsets = [0, 0, 0], sizes = [2, 8, 16], strides = [1, 1, 1]} : vector<2x8x32xf32> to vector<2x8x16xf32>
    "tpu.trace_start"() <{level = 10 : i32, message = "bij,bjh->bih"}> : () -> ()
    %cst_22 = arith.constant dense<0.000000e+00> : vector<2x8x16xf32>
    %39 = tpu.matmul %37, %38, %cst_22 {dimension_numbers = #tpu.dot_dimension_numbers<[2], [1], [1], [2], [0, 0, 0, 1, 1, 2], [0], [0]>} : vector<2x8x8xf32>, vector<2x8x16xf32>, vector<2x8x16xf32> -> vector<2x8x16xf32>
    "tpu.trace_stop"() : () -> ()
    %40 = vector.extract_strided_slice %18 {offsets = [0, 1, 0, 0], sizes = [2, 1, 8, 8], strides = [1, 1, 1, 1]} : vector<2x2x8x8xf32> to vector<2x1x8x8xf32>
    %41 = vector.shape_cast %40 : vector<2x1x8x8xf32> to vector<2x8x8xf32>
    %42 = vector.extract_strided_slice %35 {offsets = [0, 0, 16], sizes = [2, 8, 16], strides = [1, 1, 1]} : vector<2x8x32xf32> to vector<2x8x16xf32>
    "tpu.trace_start"() <{level = 10 : i32, message = "bij,bjh->bih"}> : () -> ()
    %cst_23 = arith.constant dense<0.000000e+00> : vector<2x8x16xf32>
    %43 = tpu.matmul %41, %42, %cst_23 {dimension_numbers = #tpu.dot_dimension_numbers<[2], [1], [1], [2], [0, 0, 0, 1, 1, 2], [0], [0]>} : vector<2x8x8xf32>, vector<2x8x16xf32>, vector<2x8x16xf32> -> vector<2x8x16xf32>
    "tpu.trace_stop"() : () -> ()
    %44 = tpu.concatenate %39, %43 in 2 : vector<2x8x16xf32>, vector<2x8x16xf32> -> vector<2x8x32xf32>
    %45 = vector.shape_cast %44 : vector<2x8x32xf32> to vector<16x32xf32>
    %46 = arith.addf %17, %45 : vector<16x32xf32>
    %c88_24 = arith.constant 88 : index
    %c0_25 = arith.constant 0 : index
    %47 = vector.load %arg4[%c88_24, %c0_25] : memref<472x128xf32, #tpu.memory_space<vmem>>, vector<32x64xf32>
    %c120_26 = arith.constant 120 : index
    %c0_27 = arith.constant 0 : index
    %48 = vector.load %arg4[%c120_26, %c0_27] : memref<472x128xf32, #tpu.memory_space<vmem>>, vector<1x64xf32>
    %cst_28 = arith.constant dense<0.000000e+00> : vector<16x64xf32>
    %49 = tpu.matmul %46, %47, %cst_28 {dimension_numbers = #tpu.dot_dimension_numbers<[1], [0], [0], [1], [0, 0, 1, 1], [], []>} : vector<16x32xf32>, vector<32x64xf32>, vector<16x64xf32> -> vector<16x64xf32>
    %50 = vector.broadcast %48 : vector<1x64xf32> to vector<16x64xf32>
    %51 = arith.addf %49, %50 : vector<16x64xf32>
    %cst_29 = arith.constant 0.00999999977 : f32
    %52 = vector.broadcast %cst_29 : f32 to vector<16x64xf32>
    %53 = arith.mulf %52, %51 : vector<16x64xf32>
    %54 = arith.maximumf %51, %53 : vector<16x64xf32>
    %c128_30 = arith.constant 128 : index
    %c0_31 = arith.constant 0 : index
    %55 = vector.load %arg4[%c128_30, %c0_31] : memref<472x128xf32, #tpu.memory_space<vmem>>, vector<64x32xf32>
    %c192_32 = arith.constant 192 : index
    %c0_33 = arith.constant 0 : index
    %56 = vector.load %arg4[%c192_32, %c0_33] : memref<472x128xf32, #tpu.memory_space<vmem>>, vector<1x32xf32>
    %cst_34 = arith.constant dense<0.000000e+00> : vector<16x32xf32>
    %57 = tpu.matmul %54, %55, %cst_34 {dimension_numbers = #tpu.dot_dimension_numbers<[1], [0], [0], [1], [0, 0, 1, 1], [], []>} : vector<16x64xf32>, vector<64x32xf32>, vector<16x32xf32> -> vector<16x32xf32>
    %58 = vector.broadcast %56 : vector<1x32xf32> to vector<16x32xf32>
    %59 = arith.addf %57, %58 : vector<16x32xf32>
    %cst_35 = arith.constant 0.00999999977 : f32
    %60 = vector.broadcast %cst_35 : f32 to vector<16x32xf32>
    %61 = arith.mulf %60, %59 : vector<16x32xf32>
    %62 = arith.maximumf %59, %61 : vector<16x32xf32>
    %63 = vector.shape_cast %62 : vector<16x32xf32> to vector<2x8x32xf32>
    %64 = vector.extract_strided_slice %18 {offsets = [0, 0, 0, 0], sizes = [2, 1, 8, 8], strides = [1, 1, 1, 1]} : vector<2x2x8x8xf32> to vector<2x1x8x8xf32>
    %65 = vector.shape_cast %64 : vector<2x1x8x8xf32> to vector<2x8x8xf32>
    %66 = vector.extract_strided_slice %63 {offsets = [0, 0, 0], sizes = [2, 8, 16], strides = [1, 1, 1]} : vector<2x8x32xf32> to vector<2x8x16xf32>
    "tpu.trace_start"() <{level = 10 : i32, message = "bij,bjh->bih"}> : () -> ()
    %cst_36 = arith.constant dense<0.000000e+00> : vector<2x8x16xf32>
    %67 = tpu.matmul %65, %66, %cst_36 {dimension_numbers = #tpu.dot_dimension_numbers<[2], [1], [1], [2], [0, 0, 0, 1, 1, 2], [0], [0]>} : vector<2x8x8xf32>, vector<2x8x16xf32>, vector<2x8x16xf32> -> vector<2x8x16xf32>
    "tpu.trace_stop"() : () -> ()
    %68 = vector.extract_strided_slice %18 {offsets = [0, 1, 0, 0], sizes = [2, 1, 8, 8], strides = [1, 1, 1, 1]} : vector<2x2x8x8xf32> to vector<2x1x8x8xf32>
    %69 = vector.shape_cast %68 : vector<2x1x8x8xf32> to vector<2x8x8xf32>
    %70 = vector.extract_strided_slice %63 {offsets = [0, 0, 16], sizes = [2, 8, 16], strides = [1, 1, 1]} : vector<2x8x32xf32> to vector<2x8x16xf32>
    "tpu.trace_start"() <{level = 10 : i32, message = "bij,bjh->bih"}> : () -> ()
    %cst_37 = arith.constant dense<0.000000e+00> : vector<2x8x16xf32>
    %71 = tpu.matmul %69, %70, %cst_37 {dimension_numbers = #tpu.dot_dimension_numbers<[2], [1], [1], [2], [0, 0, 0, 1, 1, 2], [0], [0]>} : vector<2x8x8xf32>, vector<2x8x16xf32>, vector<2x8x16xf32> -> vector<2x8x16xf32>
    "tpu.trace_stop"() : () -> ()
    %72 = tpu.concatenate %67, %71 in 2 : vector<2x8x16xf32>, vector<2x8x16xf32> -> vector<2x8x32xf32>
    %73 = vector.shape_cast %72 : vector<2x8x32xf32> to vector<16x32xf32>
    %74 = arith.addf %46, %73 : vector<16x32xf32>
    %c200 = arith.constant 200 : index
    %c0_38 = arith.constant 0 : index
    %75 = vector.load %arg4[%c200, %c0_38] : memref<472x128xf32, #tpu.memory_space<vmem>>, vector<32x32xf32>
    %c232 = arith.constant 232 : index
    %c0_39 = arith.constant 0 : index
    %76 = vector.load %arg4[%c232, %c0_39] : memref<472x128xf32, #tpu.memory_space<vmem>>, vector<1x32xf32>
    %cst_40 = arith.constant dense<0.000000e+00> : vector<16x32xf32>
    %77 = tpu.matmul %74, %75, %cst_40 {dimension_numbers = #tpu.dot_dimension_numbers<[1], [0], [0], [1], [0, 0, 1, 1], [], []>} : vector<16x32xf32>, vector<32x32xf32>, vector<16x32xf32> -> vector<16x32xf32>
    %78 = vector.broadcast %76 : vector<1x32xf32> to vector<16x32xf32>
    %79 = arith.addf %77, %78 : vector<16x32xf32>
    %cst_41 = arith.constant 0.00999999977 : f32
    %80 = vector.broadcast %cst_41 : f32 to vector<16x32xf32>
    %81 = arith.mulf %80, %79 : vector<16x32xf32>
    %82 = arith.maximumf %79, %81 : vector<16x32xf32>
    %c240 = arith.constant 240 : index
    %c0_42 = arith.constant 0 : index
    %83 = vector.load %arg4[%c240, %c0_42] : memref<472x128xf32, #tpu.memory_space<vmem>>, vector<32x16xf32>
    %c272 = arith.constant 272 : index
    %c0_43 = arith.constant 0 : index
    %84 = vector.load %arg4[%c272, %c0_43] : memref<472x128xf32, #tpu.memory_space<vmem>>, vector<1x16xf32>
    %cst_44 = arith.constant dense<0.000000e+00> : vector<16x16xf32>
    %85 = tpu.matmul %82, %83, %cst_44 {dimension_numbers = #tpu.dot_dimension_numbers<[1], [0], [0], [1], [0, 0, 1, 1], [], []>} : vector<16x32xf32>, vector<32x16xf32>, vector<16x16xf32> -> vector<16x16xf32>
    %86 = vector.broadcast %84 : vector<1x16xf32> to vector<16x16xf32>
    %87 = arith.addf %85, %86 : vector<16x16xf32>
    %cst_45 = arith.constant 0.00999999977 : f32
    %88 = vector.broadcast %cst_45 : f32 to vector<16x16xf32>
    %89 = arith.mulf %88, %87 : vector<16x16xf32>
    %90 = arith.maximumf %87, %89 : vector<16x16xf32>
    %c280 = arith.constant 280 : index
    %c0_46 = arith.constant 0 : index
    %91 = vector.load %arg4[%c280, %c0_46] : memref<472x128xf32, #tpu.memory_space<vmem>>, vector<16x32xf32>
    %c296 = arith.constant 296 : index
    %c0_47 = arith.constant 0 : index
    %92 = vector.load %arg4[%c296, %c0_47] : memref<472x128xf32, #tpu.memory_space<vmem>>, vector<1x32xf32>
    %cst_48 = arith.constant dense<0.000000e+00> : vector<16x32xf32>
    %93 = tpu.matmul %90, %91, %cst_48 {dimension_numbers = #tpu.dot_dimension_numbers<[1], [0], [0], [1], [0, 0, 1, 1], [], []>} : vector<16x16xf32>, vector<16x32xf32>, vector<16x32xf32> -> vector<16x32xf32>
    %94 = vector.broadcast %92 : vector<1x32xf32> to vector<16x32xf32>
    %95 = arith.addf %93, %94 : vector<16x32xf32>
    %cst_49 = arith.constant 0.00999999977 : f32
    %96 = vector.broadcast %cst_49 : f32 to vector<16x32xf32>
    %97 = arith.mulf %96, %95 : vector<16x32xf32>
    %98 = arith.maximumf %95, %97 : vector<16x32xf32>
    %c304 = arith.constant 304 : index
    %c0_50 = arith.constant 0 : index
    %99 = vector.load %arg4[%c304, %c0_50] : memref<472x128xf32, #tpu.memory_space<vmem>>, vector<32x16xf32>
    %c336 = arith.constant 336 : index
    %c0_51 = arith.constant 0 : index
    %100 = vector.load %arg4[%c336, %c0_51] : memref<472x128xf32, #tpu.memory_space<vmem>>, vector<1x16xf32>
    %cst_52 = arith.constant dense<0.000000e+00> : vector<16x16xf32>
    %101 = tpu.matmul %98, %99, %cst_52 {dimension_numbers = #tpu.dot_dimension_numbers<[1], [0], [0], [1], [0, 0, 1, 1], [], []>} : vector<16x32xf32>, vector<32x16xf32>, vector<16x16xf32> -> vector<16x16xf32>
    %102 = vector.broadcast %100 : vector<1x16xf32> to vector<16x16xf32>
    %103 = arith.addf %101, %102 : vector<16x16xf32>
    %cst_53 = arith.constant 0.00999999977 : f32
    %104 = vector.broadcast %cst_53 : f32 to vector<16x16xf32>
    %105 = arith.mulf %104, %103 : vector<16x16xf32>
    %106 = arith.maximumf %103, %105 : vector<16x16xf32>
    %c344 = arith.constant 344 : index
    %c0_54 = arith.constant 0 : index
    %107 = vector.load %arg4[%c344, %c0_54] : memref<472x128xf32, #tpu.memory_space<vmem>>, vector<16x32xf32>
    %c360 = arith.constant 360 : index
    %c0_55 = arith.constant 0 : index
    %108 = vector.load %arg4[%c360, %c0_55] : memref<472x128xf32, #tpu.memory_space<vmem>>, vector<1x32xf32>
    %cst_56 = arith.constant dense<0.000000e+00> : vector<16x32xf32>
    %109 = tpu.matmul %106, %107, %cst_56 {dimension_numbers = #tpu.dot_dimension_numbers<[1], [0], [0], [1], [0, 0, 1, 1], [], []>} : vector<16x16xf32>, vector<16x32xf32>, vector<16x32xf32> -> vector<16x32xf32>
    %110 = vector.broadcast %108 : vector<1x32xf32> to vector<16x32xf32>
    %111 = arith.addf %109, %110 : vector<16x32xf32>
    %cst_57 = arith.constant 0.00999999977 : f32
    %112 = vector.broadcast %cst_57 : f32 to vector<16x32xf32>
    %113 = arith.mulf %112, %111 : vector<16x32xf32>
    %114 = arith.maximumf %111, %113 : vector<16x32xf32>
    %c368 = arith.constant 368 : index
    %c0_58 = arith.constant 0 : index
    %115 = vector.load %arg4[%c368, %c0_58] : memref<472x128xf32, #tpu.memory_space<vmem>>, vector<32x1xf32>
    %c400 = arith.constant 400 : index
    %c0_59 = arith.constant 0 : index
    %116 = vector.load %arg4[%c400, %c0_59] : memref<472x128xf32, #tpu.memory_space<vmem>>, vector<1x1xf32>
    %cst_60 = arith.constant dense<0.000000e+00> : vector<16x1xf32>
    %117 = tpu.matmul %114, %115, %cst_60 {dimension_numbers = #tpu.dot_dimension_numbers<[1], [0], [0], [1], [0, 0, 1, 1], [], []>} : vector<16x32xf32>, vector<32x1xf32>, vector<16x1xf32> -> vector<16x1xf32>
    %118 = vector.broadcast %116 : vector<1x1xf32> to vector<16x1xf32>
    %119 = arith.addf %117, %118 : vector<16x1xf32>
    %120 = vector.extract_strided_slice %106 {offsets = [0, 0], sizes = [8, 16], strides = [1, 1]} : vector<16x16xf32> to vector<8x16xf32>
    %121 = vector.extract_strided_slice %119 {offsets = [0, 0], sizes = [8, 1], strides = [1, 1]} : vector<16x1xf32> to vector<8x1xf32>
    %cst_61 = arith.constant dense<0.000000e+00> : vector<16xf32>
    %122 = vector.multi_reduction <add>, %120, %cst_61 [0] : vector<8x16xf32> to vector<16xf32>
    %123 = vector.shape_cast %122 : vector<16xf32> to vector<1x16xf32>
    %c408 = arith.constant 408 : index
    %c0_62 = arith.constant 0 : index
    %124 = vector.load %arg4[%c408, %c0_62] : memref<472x128xf32, #tpu.memory_space<vmem>>, vector<16x32xf32>
    %c424 = arith.constant 424 : index
    %c0_63 = arith.constant 0 : index
    %125 = vector.load %arg4[%c424, %c0_63] : memref<472x128xf32, #tpu.memory_space<vmem>>, vector<1x32xf32>
    %cst_64 = arith.constant dense<0.000000e+00> : vector<1x32xf32>
    %126 = tpu.matmul %123, %124, %cst_64 {dimension_numbers = #tpu.dot_dimension_numbers<[1], [0], [0], [1], [0, 0, 1, 1], [], []>} : vector<1x16xf32>, vector<16x32xf32>, vector<1x32xf32> -> vector<1x32xf32>
    %127 = arith.addf %126, %125 : vector<1x32xf32>
    %cst_65 = arith.constant 0.00999999977 : f32
    %128 = vector.broadcast %cst_65 : f32 to vector<1x32xf32>
    %129 = arith.mulf %128, %127 : vector<1x32xf32>
    %130 = arith.maximumf %127, %129 : vector<1x32xf32>
    %c432 = arith.constant 432 : index
    %c0_66 = arith.constant 0 : index
    %131 = vector.load %arg4[%c432, %c0_66] : memref<472x128xf32, #tpu.memory_space<vmem>>, vector<32x1xf32>
    %c464 = arith.constant 464 : index
    %c0_67 = arith.constant 0 : index
    %132 = vector.load %arg4[%c464, %c0_67] : memref<472x128xf32, #tpu.memory_space<vmem>>, vector<1x1xf32>
    %cst_68 = arith.constant dense<0.000000e+00> : vector<1x1xf32>
    %133 = tpu.matmul %130, %131, %cst_68 {dimension_numbers = #tpu.dot_dimension_numbers<[1], [0], [0], [1], [0, 0, 1, 1], [], []>} : vector<1x32xf32>, vector<32x1xf32>, vector<1x1xf32> -> vector<1x1xf32>
    %134 = arith.addf %133, %132 : vector<1x1xf32>
    %135 = tpu.concatenate %121, %134 in 0 : vector<8x1xf32>, vector<1x1xf32> -> vector<9x1xf32>
    %cst_69 = arith.constant dense<0xFF800000> : vector<1xf32>
    %136 = vector.multi_reduction <maximumf>, %135, %cst_69 [0] : vector<9x1xf32> to vector<1xf32>
    %137 = vector.shape_cast %136 : vector<1xf32> to vector<1x1xf32>
    %138 = vector.broadcast %137 : vector<1x1xf32> to vector<9x1xf32>
    %139 = arith.subf %135, %138 : vector<9x1xf32>
    %140 = math.exp %139 : vector<9x1xf32>
    %cst_70 = arith.constant dense<0.000000e+00> : vector<1xf32>
    %141 = vector.multi_reduction <add>, %140, %cst_70 [0] : vector<9x1xf32> to vector<1xf32>
    %142 = vector.shape_cast %141 : vector<1xf32> to vector<1x1xf32>
    %143 = math.log %142 : vector<1x1xf32>
    %144 = vector.broadcast %143 : vector<1x1xf32> to vector<9x1xf32>
    %145 = arith.subf %139, %144 : vector<9x1xf32>
    %146 = math.exp %145 : vector<9x1xf32>
    %c0_71 = arith.constant 0 : index
    %c0_72 = arith.constant 0 : index
    %c0_73 = arith.constant 0 : index
    %147 = vector.load %arg3[%c0_71, %c0_72, %c0_73] : memref<2x9x1xf32, #tpu.memory_space<vmem>>, vector<1x9x1xf32>
    %148 = vector.shape_cast %147 : vector<1x9x1xf32> to vector<9x1xf32>
    %cst_74 = arith.constant 5.000000e-01 : f32
    %149 = vector.broadcast %cst_74 : f32 to vector<9x1xf32>
    %150 = arith.cmpf ogt, %148, %149 : vector<9x1xf32>
    %cst_75 = arith.constant 0.000000e+00 : f32
    %cst_76 = arith.constant -103.616325 : f32
    %151 = vector.broadcast %cst_75 : f32 to vector<9x1xf32>
    %152 = vector.broadcast %cst_76 : f32 to vector<9x1xf32>
    %153 = arith.select %150, %151, %152 : vector<9x1xi1>, vector<9x1xf32>
    %154 = arith.addf %135, %153 : vector<9x1xf32>
    %cst_77 = arith.constant dense<0xFF800000> : vector<1xf32>
    %155 = vector.multi_reduction <maximumf>, %154, %cst_77 [0] : vector<9x1xf32> to vector<1xf32>
    %156 = vector.shape_cast %155 : vector<1xf32> to vector<1x1xf32>
    %157 = vector.broadcast %156 : vector<1x1xf32> to vector<9x1xf32>
    %158 = arith.subf %154, %157 : vector<9x1xf32>
    %159 = math.exp %158 : vector<9x1xf32>
    %cst_78 = arith.constant dense<0.000000e+00> : vector<1xf32>
    %160 = vector.multi_reduction <add>, %159, %cst_78 [0] : vector<9x1xf32> to vector<1xf32>
    %161 = vector.shape_cast %160 : vector<1xf32> to vector<1x1xf32>
    %162 = math.log %161 : vector<1x1xf32>
    %163 = vector.broadcast %162 : vector<1x1xf32> to vector<9x1xf32>
    %164 = arith.subf %158, %163 : vector<9x1xf32>
    %165 = math.exp %164 : vector<9x1xf32>
    %166 = tpu.concatenate %145, %146, %164, %165 in 1 : vector<9x1xf32>, vector<9x1xf32>, vector<9x1xf32>, vector<9x1xf32> -> vector<9x4xf32>
    %c0_79 = arith.constant 0 : index
    %c0_80 = arith.constant 0 : index
    %c0_81 = arith.constant 0 : index
    %167 = vector.load %arg5[%c0_79, %c0_80, %c0_81] : memref<2x9x4xf32, #tpu.memory_space<vmem>>, vector<1x9x4xf32>
    %168 = vector.shape_cast %167 : vector<1x9x4xf32> to vector<9x4xf32>
    %169 = vector.shape_cast %166 : vector<9x4xf32> to vector<1x9x4xf32>
    tpu.vector_store %arg5[%c0_79, %c0_80, %c0_81], %169 {strides = array<i32>} : memref<2x9x4xf32, #tpu.memory_space<vmem>>, vector<1x9x4xf32>,
    %170 = vector.extract_strided_slice %106 {offsets = [8, 0], sizes = [8, 16], strides = [1, 1]} : vector<16x16xf32> to vector<8x16xf32>
    %171 = vector.extract_strided_slice %119 {offsets = [8, 0], sizes = [8, 1], strides = [1, 1]} : vector<16x1xf32> to vector<8x1xf32>
    %cst_82 = arith.constant dense<0.000000e+00> : vector<16xf32>
    %172 = vector.multi_reduction <add>, %170, %cst_82 [0] : vector<8x16xf32> to vector<16xf32>
    %173 = vector.shape_cast %172 : vector<16xf32> to vector<1x16xf32>
    %c408_83 = arith.constant 408 : index
    %c0_84 = arith.constant 0 : index
    %174 = vector.load %arg4[%c408_83, %c0_84] : memref<472x128xf32, #tpu.memory_space<vmem>>, vector<16x32xf32>
    %c424_85 = arith.constant 424 : index
    %c0_86 = arith.constant 0 : index
    %175 = vector.load %arg4[%c424_85, %c0_86] : memref<472x128xf32, #tpu.memory_space<vmem>>, vector<1x32xf32>
    %cst_87 = arith.constant dense<0.000000e+00> : vector<1x32xf32>
    %176 = tpu.matmul %173, %174, %cst_87 {dimension_numbers = #tpu.dot_dimension_numbers<[1], [0], [0], [1], [0, 0, 1, 1], [], []>} : vector<1x16xf32>, vector<16x32xf32>, vector<1x32xf32> -> vector<1x32xf32>
    %177 = arith.addf %176, %175 : vector<1x32xf32>
    %cst_88 = arith.constant 0.00999999977 : f32
    %178 = vector.broadcast %cst_88 : f32 to vector<1x32xf32>
    %179 = arith.mulf %178, %177 : vector<1x32xf32>
    %180 = arith.maximumf %177, %179 : vector<1x32xf32>
    %c432_89 = arith.constant 432 : index
    %c0_90 = arith.constant 0 : index
    %181 = vector.load %arg4[%c432_89, %c0_90] : memref<472x128xf32, #tpu.memory_space<vmem>>, vector<32x1xf32>
    %c464_91 = arith.constant 464 : index
    %c0_92 = arith.constant 0 : index
    %182 = vector.load %arg4[%c464_91, %c0_92] : memref<472x128xf32, #tpu.memory_space<vmem>>, vector<1x1xf32>
    %cst_93 = arith.constant dense<0.000000e+00> : vector<1x1xf32>
    %183 = tpu.matmul %180, %181, %cst_93 {dimension_numbers = #tpu.dot_dimension_numbers<[1], [0], [0], [1], [0, 0, 1, 1], [], []>} : vector<1x32xf32>, vector<32x1xf32>, vector<1x1xf32> -> vector<1x1xf32>
    %184 = arith.addf %183, %182 : vector<1x1xf32>
    %185 = tpu.concatenate %171, %184 in 0 : vector<8x1xf32>, vector<1x1xf32> -> vector<9x1xf32>
    %cst_94 = arith.constant dense<0xFF800000> : vector<1xf32>
    %186 = vector.multi_reduction <maximumf>, %185, %cst_94 [0] : vector<9x1xf32> to vector<1xf32>
    %187 = vector.shape_cast %186 : vector<1xf32> to vector<1x1xf32>
    %188 = vector.broadcast %187 : vector<1x1xf32> to vector<9x1xf32>
    %189 = arith.subf %185, %188 : vector<9x1xf32>
    %190 = math.exp %189 : vector<9x1xf32>
    %cst_95 = arith.constant dense<0.000000e+00> : vector<1xf32>
    %191 = vector.multi_reduction <add>, %190, %cst_95 [0] : vector<9x1xf32> to vector<1xf32>
    %192 = vector.shape_cast %191 : vector<1xf32> to vector<1x1xf32>
    %193 = math.log %192 : vector<1x1xf32>
    %194 = vector.broadcast %193 : vector<1x1xf32> to vector<9x1xf32>
    %195 = arith.subf %189, %194 : vector<9x1xf32>
    %196 = math.exp %195 : vector<9x1xf32>
    %c1 = arith.constant 1 : index
    %c0_96 = arith.constant 0 : index
    %c0_97 = arith.constant 0 : index
    %197 = vector.load %arg3[%c1, %c0_96, %c0_97] : memref<2x9x1xf32, #tpu.memory_space<vmem>>, vector<1x9x1xf32>
    %198 = vector.shape_cast %197 : vector<1x9x1xf32> to vector<9x1xf32>
    %cst_98 = arith.constant 5.000000e-01 : f32
    %199 = vector.broadcast %cst_98 : f32 to vector<9x1xf32>
    %200 = arith.cmpf ogt, %198, %199 : vector<9x1xf32>
    %cst_99 = arith.constant 0.000000e+00 : f32
    %cst_100 = arith.constant -103.616325 : f32
    %201 = vector.broadcast %cst_99 : f32 to vector<9x1xf32>
    %202 = vector.broadcast %cst_100 : f32 to vector<9x1xf32>
    %203 = arith.select %200, %201, %202 : vector<9x1xi1>, vector<9x1xf32>
    %204 = arith.addf %185, %203 : vector<9x1xf32>
    %cst_101 = arith.constant dense<0xFF800000> : vector<1xf32>
    %205 = vector.multi_reduction <maximumf>, %204, %cst_101 [0] : vector<9x1xf32> to vector<1xf32>
    %206 = vector.shape_cast %205 : vector<1xf32> to vector<1x1xf32>
    %207 = vector.broadcast %206 : vector<1x1xf32> to vector<9x1xf32>
    %208 = arith.subf %204, %207 : vector<9x1xf32>
    %209 = math.exp %208 : vector<9x1xf32>
    %cst_102 = arith.constant dense<0.000000e+00> : vector<1xf32>
    %210 = vector.multi_reduction <add>, %209, %cst_102 [0] : vector<9x1xf32> to vector<1xf32>
    %211 = vector.shape_cast %210 : vector<1xf32> to vector<1x1xf32>
    %212 = math.log %211 : vector<1x1xf32>
    %213 = vector.broadcast %212 : vector<1x1xf32> to vector<9x1xf32>
    %214 = arith.subf %208, %213 : vector<9x1xf32>
    %215 = math.exp %214 : vector<9x1xf32>
    %216 = tpu.concatenate %195, %196, %214, %215 in 1 : vector<9x1xf32>, vector<9x1xf32>, vector<9x1xf32>, vector<9x1xf32> -> vector<9x4xf32>
    %c1_103 = arith.constant 1 : index
    %c0_104 = arith.constant 0 : index
    %c0_105 = arith.constant 0 : index
    %217 = vector.load %arg5[%c1_103, %c0_104, %c0_105] : memref<2x9x4xf32, #tpu.memory_space<vmem>>, vector<1x9x4xf32>
    %218 = vector.shape_cast %217 : vector<1x9x4xf32> to vector<9x4xf32>
    %219 = vector.shape_cast %216 : vector<9x4xf32> to vector<1x9x4xf32>
    tpu.vector_store %arg5[%c1_103, %c0_104, %c0_105], %219 {strides = array<i32>} : memref<2x9x4xf32, #tpu.memory_space<vmem>>, vector<1x9x4xf32>,
    return
  }
  func.func @transform_0(%arg0: i32) -> (i32, i32, i32) {
    %c0_i32 = arith.constant 0 : i32
    %c0_i32_0 = arith.constant 0 : i32
    %c0_i32_1 = arith.constant 0 : i32
    return %arg0, %c0_i32, %c0_i32_0 : i32, i32, i32
  }
  func.func @transform_1(%arg0: i32) -> (i32, i32, i32, i32) {
    %c0_i32 = arith.constant 0 : i32
    %c0_i32_0 = arith.constant 0 : i32
    %c0_i32_1 = arith.constant 0 : i32
    %c0_i32_2 = arith.constant 0 : i32
    return %arg0, %c0_i32, %c0_i32_0, %c0_i32_1 : i32, i32, i32, i32
  }
  func.func @transform_2(%arg0: i32) -> (i32, i32, i32) {
    %c0_i32 = arith.constant 0 : i32
    %c0_i32_0 = arith.constant 0 : i32
    %c0_i32_1 = arith.constant 0 : i32
    return %arg0, %c0_i32, %c0_i32_0 : i32, i32, i32
  }
  func.func @transform_3(%arg0: i32) -> (i32, i32) {
    %c0_i32 = arith.constant 0 : i32
    %c0_i32_0 = arith.constant 0 : i32
    %c0_i32_1 = arith.constant 0 : i32
    return %c0_i32, %c0_i32_0 : i32, i32
  }
  func.func @transform_4(%arg0: i32) -> (i32, i32, i32) {
    %c0_i32 = arith.constant 0 : i32
    %c0_i32_0 = arith.constant 0 : i32
    %c0_i32_1 = arith.constant 0 : i32
    return %arg0, %c0_i32, %c0_i32_0 : i32, i32, i32
  }
}

</mosaic_0001>

<bundles_post_ra>
// kernel: policy_forward.1
= control target key start
LH: loop header
LB: loop body
LE: loop exit
PB: predicated region body
PF: predicated region fallthrough
CT: control target
= control target key end

     0   :  { %vm33_vm0 = vcmask 1041408   ;;  %vm26_vm1 = vcmask 80896   ;;  %vm2881_vm2 = vmmov 1   ;;  %vm129_vm4 = vcmask 523264   ;;  %s2884_s19 = smov 112   ;;  %s2888_s17 = smov 2   ;;  %s3365_s3 = inlined_call_operand.vmem [shape: f32[472,128], index: 3, kind: input, shape index: {}]   ;;  %s3366_s0 = inlined_call_operand.vmem [shape: f32[2,8,10], index: 0, kind: input, shape index: {}]   ;;  %s3367_s1 = inlined_call_operand.vmem [shape: f32[2,2,8,8], index: 1, kind: input, shape index: {}]   ;;  %s3368_s2 = inlined_call_operand.vmem [shape: f32[2,9,1], index: 2, kind: input, shape index: {}]   ;;  %s3369_s4 = inlined_call_operand.vmem [shape: f32[2,9,4], index: 4, kind: output, shape index: {}]  }
   0x1   :  { %v19_v0 = vld [vmem:[%s3365_s3] sm:$0xff]  ;;  %v20_v1 = vld [vmem:[%s3365_s3 + $0x8] sm:$0x3]  ;;  %vm2704_vm3 = vmpackc.low %vm33_vm0, %vm2881_vm2  ;;  %vm228_vm5 = vcmask 261120   ;;  %v2882_v62 = vmov 0.0   ;;  %vm2883_vm6 = vmmov 0  }
   0x2   :  { %v2703_v2 = vpack.c.bf16 %v20_v1, %v19_v0  ;;  %v17_v3 = vld [vmem:[%s3366_s0] sm:$0xff]  ;;  %v116_v4 = vld [vmem:[%s3365_s3 + $0x10] sm:$0xff]  ;;  %v117_v5 = vld [vmem:[%s3365_s3 + $0x18] sm:$0xff]  ;;  %vm412_vm7 = vcmask 64512   ;;  %vm721_vm8 = vcmask 130048   ;;  %vm1937_vm11 = vcmask 7168  }
   0x3   :  { %2487 = vmatprep.mubr.msk.f32.mxu0 %vm26_vm1, %v17_v3  ;;  %v118_v6 = vld [vmem:[%s3365_s3 + $0x20] sm:$0xff]  ;;  %v119_v7 = vld [vmem:[%s3365_s3 + $0x28] sm:$0xff]  ;;  %v2709_v8 = vpack.c.bf16 %v117_v5, %v116_v4  ;;  %v120_v11 = vld [vmem:[%s3365_s3 + $0x30] sm:$0xff]  ;;  %vm1939_vm12 = vcmask 0   ;;  %s2889_s18 = smov 1   ;;  %vm2037_vm13 = vcmask 15360  }
   0x4   :  { %2705 = vmatprep.subr.msk.bf16.mxu0 %vm2704_vm3, %v2703_v2  ;;  %v2713_v9 = vpack.c.bf16 %v119_v7, %v118_v6  ;;  %v18_v10 = vld [vmem:[%s3366_s0 + $0x8] sm:$0xff]  ;;  %v121_v12 = vld [vmem:[%s3365_s3 + $0x38] sm:$0xff]  ;;  %v122_v14 = vld [vmem:[%s3365_s3 + $0x40] sm:$0xff]  ;;  %vm2040_vm14 = vcmask 23552   ;;  %vm2043_vm15 = vcmask 31744   ;;  %vm2045_vm0 = vcmask 24576  }
   0x5   :  { %2708 = vmatpush3.bf16.msk.msra.mxu0 %vm2704_vm3, %v2703_v2  ;;  %2710 = vmatprep.subr.bf16.mxu1 %v2709_v8  ;;  %v2717_v13 = vpack.c.bf16 %v121_v12, %v120_v11  ;;  %v123_v15 = vld [vmem:[%s3365_s3 + $0x48] sm:$0xff]  ;;  %v219_v26 = vld [vmem:[%s3365_s3 + $0x58] sm:$0xff]  ;;  %v220_v27 = vld [vmem:[%s3365_s3 + $0x60] sm:$0xff] }
   0x6   :  { %2712 = vmatpush3.bf16.msra.mxu1 %v2709_v8  ;;  %v2721_v16 = vpack.c.bf16 %v123_v15, %v122_v14  ;;  %v2320_v17 = vld [vmem:[%s3365_s3 + $0xa] ss:$0 sm:$0xff]  ;;  %v2965_v28 = vpack.c.bf16 %v220_v27, %v219_v26  ;;  %v222_v30 = vld [vmem:[%s3365_s3 + $0x70] sm:$0xff]  ;;  %v314_v32 = vld [vmem:[%s3365_s3 + $0x80] sm:$0xff] }
   0x7   :  { %2714 = vmatprep.subr.bf16.mxu1 %v2713_v9  ;;  %v221_v29 = vld [vmem:[%s3365_s3 + $0x68] sm:$0xff]  ;;  %v2324_v35 = vld [vmem:[%s3365_s3 + $0x50] ss:$0 sm:$0xff]  ;;  %v317_v43 = vld [vmem:[%s3365_s3 + $0x98] sm:$0xff] }
   0x8   :  { %2488 = vmatmul.mubr.msk.f32.vlgmr.msra.gmra.mrb[0].mxu0 %vm26_vm1, %v18_v10  ;;  %2726 = vmatprep.subr.bf16.mxu0 %v2965_v28  ;;  %v2975_v31 = vpack.c.bf16 %v222_v30, %v221_v29  ;;  %v315_v33 = vld [vmem:[%s3365_s3 + $0x88] sm:$0xff]  ;;  %v316_v42 = vld [vmem:[%s3365_s3 + $0x90] sm:$0xff]  ;;  %v318_v47 = vld [vmem:[%s3365_s3 + $0xa0] sm:$0xff] }
   0x9   :  { %2728 = vmatpush3.bf16.msra.mxu0 %v2965_v28  ;;  %v2985_v34 = vpack.c.bf16 %v315_v33, %v314_v32  ;;  %v3001_v46 = vpack.c.bf16 %v317_v43, %v316_v42  ;;  %v319_v48 = vld [vmem:[%s3365_s3 + $0xa8] sm:$0xff]  ;;  %v320_v50 = vld [vmem:[%s3365_s3 + $0xb0] sm:$0xff]  ;;  %v321_v51 = vld [vmem:[%s3365_s3 + $0xb8] sm:$0xff] }
   0xa   :  { %2716 = vmatpush3.bf16.msra.mxu1 %v2713_v9  ;;  %2730 = vmatprep.subr.bf16.mxu0 %v2975_v31  ;;  %v3016_v49 = vpack.c.bf16 %v319_v48, %v318_v47  ;;  %v3026_v52 = vpack.c.bf16 %v321_v51, %v320_v50  ;;  %v3033_v53 = vld [vmem:[%s3365_s3 + $0x78] ss:$0 sm:$0xff]  ;;  %v3048_v63 = vld [vmem:[%s3365_s3 + $0xc0] ss:$0 sm:$0xff]  ;;  %v3066_v9 = vld [vmem:[%s3367_s1 + $0x10] sm:$0xff] }
   0xb   :  { %2718 = vmatprep.subr.bf16.mxu1 %v2717_v13  ;;  %v3055_v7 = vld [vmem:[%s3367_s1] sm:$0xff]  ;;  %v3077_v10 = vld [vmem:[%s3367_s1 + $0x8] sm:$0xff]  ;;  %v3085_v12 = vld [vmem:[%s3367_s1 + $0x18] sm:$0xff]  ;;  %s2885_s1 = smov 16  }
   0xc   :  { %v1219_v47 = vld [vmem:[%s3365_s3 + $0xd0] sm:$0xff] }
   0xd   :  { %2732 = vmatpush3.bf16.msra.mxu0 %v2975_v31 }
   0xe   :  { %2720 = vmatpush3.bf16.msra.mxu1 %v2717_v13  ;;  %2734 = vmatprep.subr.bf16.mxu0 %v2985_v34 }
   0xf   :  { %2722 = vmatprep.subr.bf16.mxu1 %v2721_v16 }
  0x12   :  { %2724 = vmatpush3.bf16.msra.mxu1 %v2721_v16 }
  0x13   :  { %2539 = vmatprep.subr.mxu1 %v2882_v62 }
  0xdb   :  { %v2489_v18 = vpop.f32.mrb[0].mxu0 }
  0xdc   :  { %v109_v19 = vadd.f32 %v2489_v18, %v2320_v17  ;;  %v103_v20 = vpop.f32.mrb[1].mxu0 }
  0xdd   :  { %v104_v21 = vadd.f32 %v2320_v17, %v103_v20 }
  0xde   :  { %v113_v22 = vmul.f32 0.01, %v109_v19 }
  0xdf   :  { %v112_v23 = vmul.f32 0.01, %v104_v21 }
  0xe0   :  { %v115_v25 = vmax.f32 %v109_v19, %v113_v22 }
  0xe1   :  { %v114_v24 = vmax.f32 %v104_v21, %v112_v23 }
  0xe3   :  { %2506 = vmatprep.mubr.msk.f32.mxu1 %vm129_vm4, %v114_v24 }
  0xe4   :  { %2507 = vmatmul.mubr.msk.f32.vlgmr.msra.gmra.mrb[0].mxu1 %vm129_vm4, %v115_v25 }
  0xe5   :  { %2541 = vmatprep.mubr.msk.f32.mxu1 %vm2883_vm6, %v2882_v62 }
 0x1b7   :  { %v2508_v36 = vpop.f32.mrb[0].mxu1 }
 0x1b8   :  { %v208_v37 = vadd.f32 %v2508_v36, %v2324_v35  ;;  %v202_v38 = vpop.f32.mrb[1].mxu1 }
 0x1b9   :  { %v203_v39 = vadd.f32 %v2324_v35, %v202_v38 }
 0x1ba   :  { %v212_v40 = vmul.f32 0.01, %v208_v37 }
 0x1bb   :  { %v211_v41 = vmul.f32 0.01, %v203_v39 }
 0x1bc   :  { %v2999_v45 = vmax.f32 %v208_v37, %v212_v40 }
 0x1bd   :  { %v2997_v44 = vmax.f32 %v203_v39, %v211_v41 }
 0x1bf   :  { %2517 = vmatprep.mubr.msk.f32.mxu0 %vm228_vm5, %v2997_v44 }
 0x1c0   :  { %2518 = vmatmul.mubr.msk.f32.vlgmr.msra.gmra.mrb[2].mxu0 %vm228_vm5, %v2999_v45 }
 0x1c1   :  { %2736 = vmatpush3.bf16.msra.mxu0 %v2985_v34 }
 0x1c2   :  { %2738 = vmatprep.subr.bf16.mxu0 %v3001_v46 }
 0x1c5   :  { %2740 = vmatpush3.bf16.msra.mxu0 %v3001_v46 }
 0x1c6   :  { %2742 = vmatprep.subr.bf16.mxu0 %v3016_v49 }
 0x1c9   :  { %2744 = vmatpush3.bf16.msra.mxu0 %v3016_v49 }
 0x1ca   :  { %2746 = vmatprep.subr.bf16.mxu0 %v3026_v52 }
 0x1cd   :  { %2748 = vmatpush3.bf16.msra.mxu0 %v3026_v52 }
 0x1ce   :  { %2554 = vmatprep.subr.mxu0 %v2882_v62 }
 0x293   :  { %v2519_v54 = vpop.f32.mrb[2].mxu0 }
 0x294   :  { %v307_v55 = vadd.f32 %v2519_v54, %v3033_v53  ;;  %v301_v56 = vpop.f32.mrb[3].mxu0  ;;  %v1221_v54 = vld [vmem:[%s3365_s3 + $0xe0] sm:$0xff] }
 0x295   :  { %v302_v57 = vadd.f32 %v3033_v53, %v301_v56 }
 0x296   :  { %v311_v58 = vmul.f32 0.01, %v307_v55 }
 0x297   :  { %v310_v59 = vmul.f32 0.01, %v302_v57 }
 0x298   :  { %v313_v61 = vmax.f32 %v307_v55, %v311_v58 }
 0x299   :  { %v312_v60 = vmax.f32 %v302_v57, %v310_v59 }
 0x29b   :  { %2536 = vmatprep.mubr.msk.f32.mxu0 %vm129_vm4, %v312_v60 }
 0x29c   :  { %2537 = vmatmul.mubr.msk.f32.vlgmr.msra.gmra.mrb[4].mxu0 %vm129_vm4, %v313_v61 }
 0x29d   :  { %2556 = vmatprep.mubr.msk.f32.mxu0 %vm2883_vm6, %v2882_v62 }
 0x36f   :  { %v2538_v0 = vpop.f32.mrb[4].mxu0 }
 0x370   :  { %v405_v1 = vadd.f32 %v2538_v0, %v3048_v63  ;;  %v399_v2 = vpop.f32.mrb[5].mxu0 }
 0x371   :  { %v400_v3 = vadd.f32 %v3048_v63, %v399_v2 }
 0x372   :  { %v409_v4 = vmul.f32 0.01, %v405_v1 }
 0x373   :  { %v408_v5 = vmul.f32 0.01, %v400_v3 }
 0x374   :  { %v411_v8 = vmax.f32 %v405_v1, %v409_v4  ;;  %v1313_v4 = vld [vmem:[%s3365_s3 + $0xf8] sm:$0xff] }
 0x375   :  { %v410_v6 = vmax.f32 %v400_v3, %v408_v5  ;;  %v1312_v3 = vld [vmem:[%s3365_s3 + $0xf0] sm:$0xff] }
 0x376   :  { %v2781_v5 = vpack.c.bf16 %v1313_v4, %v1312_v3 }
 0x377   :  { %560 = vrot.lane.b32.xlu0 %v410_v6, %s2884_s19  ;;  %2540 = vmatpush3.msra.mxu1 %v410_v6  ;;  %v1314_v6 = vld [vmem:[%s3365_s3 + $0x100] sm:$0xff] }
 0x378   :  { %2544 = vmatprep.subr.mxu1 %v2882_v62  ;;  %2542 = vmatmul.mubr.msk.f32.vlgmr.msra.gmra.mrb[2].mxu1 %vm412_vm7, %v3055_v7 }
 0x379   :  { %2545 = vmatpush3.msra.mxu1 %v411_v8  ;;  %2546 = vmatprep.mubr.msk.f32.mxu1 %vm2883_vm6, %v2882_v62 }
 0x37a   :  { %2549 = vmatprep.subr.mxu1 %v2882_v62 }
 0x37b   :  { %637 = vrot.lane.b32.xlu0 %v411_v8, %s2884_s19 }
 0x37c   :  { %2547 = vmatmul.mubr.msk.f32.vlgmr.msra.gmra.mrb[4].mxu1 %vm412_vm7, %v3066_v9 }
 0x37d   :  { %2551 = vmatprep.mubr.msk.f32.mxu1 %vm2883_vm6, %v2882_v62 }
 0x3e9   :  { %v561_v11 = vpop.permute.xlu0 %560 }
 0x3ea   :  { %2550 = vmatpush3.msra.mxu1 %v561_v11 }
 0x3eb   :  { %2552 = vmatmul.mubr.msk.f32.vlgmr.msra.gmra.mrb[6].mxu1 %vm412_vm7, %v3077_v10  ;;  %2750 = vmatprep.subr.bf16.mxu1 %v2965_v28 }
 0x3ec   :  { %2752 = vmatpush3.bf16.msra.mxu1 %v2965_v28 }
 0x3ed   :  { %v638_v13 = vpop.permute.xlu0 %637  ;;  %2754 = vmatprep.subr.bf16.mxu1 %v2975_v31 }
 0x3ee   :  { %2555 = vmatpush3.msra.mxu0 %v638_v13 }
 0x3ef   :  { %2557 = vmatmul.mubr.msk.f32.vlgmr.msra.gmra.mrb[6].mxu0 %vm412_vm7, %v3085_v12  ;;  %2758 = vmatprep.subr.bf16.mxu0 %v2985_v34 }
 0x3f0   :  { %2756 = vmatpush3.bf16.msra.mxu1 %v2975_v31  ;;  %2760 = vmatpush3.bf16.msra.mxu0 %v2985_v34 }
 0x3f1   :  { %2762 = vmatprep.subr.bf16.mxu0 %v3001_v46  ;;  %2589 = vmatprep.subr.mxu1 %v2882_v62 }
 0x3f4   :  { %2764 = vmatpush3.bf16.msra.mxu0 %v3001_v46  ;;  %v1218_v46 = vld [vmem:[%s3365_s3 + $0xc8] sm:$0xff] }
 0x3f5   :  { %2766 = vmatprep.subr.bf16.mxu0 %v3016_v49  ;;  %v2773_v48 = vpack.c.bf16 %v1219_v47, %v1218_v46  ;;  %v1593_v46 = vld [vmem:[%s3365_s3 + $0x160] sm:$0xff] }
 0x3f8   :  { %2768 = vmatpush3.bf16.msra.mxu0 %v3016_v49 }
 0x3f9   :  { %2770 = vmatprep.subr.bf16.mxu0 %v3026_v52 }
 0x3fc   :  { %2772 = vmatpush3.bf16.msra.mxu0 %v3026_v52 }
 0x3fd   :  { %2604 = vmatprep.subr.mxu0 %v2882_v62 }
 0x44b   :  { %v482_v14 = vpop.f32.mrb[2].mxu1 }
 0x44c   :  { %v2543_v15 = vpop.f32.mrb[3].mxu1 }
 0x44f   :  { %v555_v16 = vpop.f32.mrb[4].mxu1 }
 0x450   :  { %v2548_v17 = vpop.f32.mrb[5].mxu1 }
 0x4be   :  { %v632_v18 = vpop.f32.mrb[6].mxu1 }
 0x4bf   :  { %715 = vrot.lane.b32.xlu1 %v632_v18, %s2885_s1  ;;  %v2553_v19 = vpop.f32.mrb[7].mxu1  ;;  %v1406_v18 = vld [vmem:[%s3365_s3 + $0x118] sm:$0xff] }
 0x4c0   :  { %v1407_v19 = vld [vmem:[%s3365_s3 + $0x120] sm:$0xff] }
 0x4c2   :  { %v709_v20 = vpop.f32.mrb[6].mxu0 }
 0x4c3   :  { %v2558_v21 = vpop.f32.mrb[7].mxu0  ;;  %717 = vrot.lane.b32.xlu1 %v709_v20, %s2885_s1  ;;  %v2789_v20 = vpack.c.bf16 %v1407_v19, %v1406_v18 }
 0x4c4   :  { %v2350_v21 = vld [vmem:[%s3365_s3 + $0x110] ss:$0 sm:$0xff] }
 0x531   :  { %v716_v22 = vpop.permute.xlu1 %715 }
 0x532   :  { %v722_v23 = vsel %vm721_vm8, %v482_v14, %v716_v22 }
 0x533   :  { %v3106_v24 = vadd.f32 %v722_v23, %v2997_v44 }
 0x535   :  { %2567 = vmatprep.mubr.msk.f32.mxu1 %vm228_vm5, %v3106_v24  ;;  %v718_v25 = vpop.permute.xlu1 %717 }
 0x536   :  { %v723_v26 = vsel %vm721_vm8, %v555_v16, %v718_v25 }
 0x537   :  { %v3112_v27 = vadd.f32 %v723_v26, %v2999_v45 }
 0x539   :  { %2568 = vmatmul.mubr.msk.f32.vlgmr.msra.gmra.mrb[8].mxu1 %vm228_vm5, %v3112_v27 }
 0x53a   :  { %2591 = vmatprep.mubr.msk.f32.mxu1 %vm2883_vm6, %v2882_v62 }
 0x60c   :  { %v2569_v28 = vpop.f32.mrb[8].mxu1 }
 0x60d   :  { %v813_v29 = vadd.f32 %v2569_v28, %v3033_v53  ;;  %v807_v30 = vpop.f32.mrb[9].mxu1 }
 0x60e   :  { %v808_v31 = vadd.f32 %v3033_v53, %v807_v30  ;;  %v1220_v53 = vld [vmem:[%s3365_s3 + $0xd8] sm:$0xff]  ;;  %v1498_v30 = vld [vmem:[%s3365_s3 + $0x130] sm:$0xff] }
 0x60f   :  { %v817_v32 = vmul.f32 0.01, %v813_v29  ;;  %v2777_v55 = vpack.c.bf16 %v1221_v54, %v1220_v53 }
 0x610   :  { %v816_v33 = vmul.f32 0.01, %v808_v31 }
 0x611   :  { %v819_v35 = vmax.f32 %v813_v29, %v817_v32 }
 0x612   :  { %v818_v34 = vmax.f32 %v808_v31, %v816_v33  ;;  %v1499_v31 = vld [vmem:[%s3365_s3 + $0x138] sm:$0xff]  ;;  %v1500_v33 = vld [vmem:[%s3365_s3 + $0x140] sm:$0xff] }
 0x613   :  { %v2793_v32 = vpack.c.bf16 %v1499_v31, %v1498_v30 }
 0x614   :  { %2586 = vmatprep.mubr.msk.f32.mxu0 %vm129_vm4, %v818_v34  ;;  %v1501_v34 = vld [vmem:[%s3365_s3 + $0x148] sm:$0xff] }
 0x615   :  { %2587 = vmatmul.mubr.msk.f32.vlgmr.msra.gmra.mrb[8].mxu0 %vm129_vm4, %v819_v35  ;;  %v2797_v35 = vpack.c.bf16 %v1501_v34, %v1500_v33 }
 0x616   :  { %2606 = vmatprep.mubr.msk.f32.mxu0 %vm2883_vm6, %v2882_v62 }
 0x6e8   :  { %v2588_v36 = vpop.f32.mrb[8].mxu0 }
 0x6e9   :  { %v911_v37 = vadd.f32 %v2588_v36, %v3048_v63  ;;  %v905_v38 = vpop.f32.mrb[9].mxu0  ;;  %v2353_v36 = vld [vmem:[%s3365_s3 + $0x128] ss:$0 sm:$0xff] }
 0x6ea   :  { %v906_v39 = vadd.f32 %v3048_v63, %v905_v38 }
 0x6eb   :  { %v915_v40 = vmul.f32 0.01, %v911_v37 }
 0x6ec   :  { %v914_v41 = vmul.f32 0.01, %v906_v39 }
 0x6ed   :  { %v917_v42 = vmax.f32 %v911_v37, %v915_v40 }
 0x6ee   :  { %v916_v43 = vmax.f32 %v906_v39, %v914_v41 }
 0x6ef   :  { %1133 = vrot.lane.b32.xlu1 %v917_v42, %s2884_s19 }
 0x6f0   :  { %1059 = vrot.lane.b32.xlu0 %v916_v43, %s2884_s19  ;;  %2590 = vmatpush3.msra.mxu1 %v916_v43  ;;  %s2890_s19 = smov 3  }
 0x6f1   :  { %2594 = vmatprep.subr.mxu1 %v2882_v62  ;;  %2592 = vmatmul.mubr.msk.f32.vlgmr.msra.gmra.mrb[10].mxu1 %vm412_vm7, %v3055_v7  ;;  %v1315_v7 = vld [vmem:[%s3365_s3 + $0x108] sm:$0xff] }
 0x6f2   :  { %2595 = vmatpush3.msra.mxu1 %v917_v42  ;;  %2596 = vmatprep.mubr.msk.f32.mxu1 %vm2883_vm6, %v2882_v62  ;;  %v2785_v8 = vpack.c.bf16 %v1315_v7, %v1314_v6  ;;  %v1685_v6 = vld [vmem:[%s3365_s3 + $0x178] sm:$0xff] }
 0x6f3   :  { %2599 = vmatprep.subr.mxu1 %v2882_v62 }
 0x6f5   :  { %2597 = vmatmul.mubr.msk.f32.vlgmr.msra.gmra.mrb[12].mxu1 %vm412_vm7, %v3066_v9  ;;  %v2347_v9 = vld [vmem:[%s3365_s3 + $0xe8] ss:$0 sm:$0xff] }
 0x6f6   :  { %2601 = vmatprep.mubr.msk.f32.mxu1 %vm2883_vm6, %v2882_v62 }
 0x761   :  { %v1134_v44 = vpop.permute.xlu1 %1133 }
 0x762   :  { %2605 = vmatpush3.msra.mxu0 %v1134_v44  ;;  %v1060_v45 = vpop.permute.xlu0 %1059 }
 0x763   :  { %2600 = vmatpush3.msra.mxu1 %v1060_v45  ;;  %2607 = vmatmul.mubr.msk.f32.vlgmr.msra.gmra.mrb[10].mxu0 %vm412_vm7, %v3085_v12  ;;  %v1592_v45 = vld [vmem:[%s3365_s3 + $0x158] sm:$0xff] }
 0x764   :  { %2602 = vmatmul.mubr.msk.f32.vlgmr.msra.gmra.mrb[14].mxu1 %vm412_vm7, %v3077_v10  ;;  %2774 = vmatprep.subr.bf16.mxu1 %v2773_v48  ;;  %v2801_v47 = vpack.c.bf16 %v1593_v46, %v1592_v45  ;;  %v1972_v45 = vld [vmem:[%s3368_s2 + $0x8] sm:$0x1] }
 0x765   :  { %2776 = vmatpush3.bf16.msra.mxu1 %v2773_v48  ;;  %2782 = vmatprep.subr.bf16.mxu0 %v2781_v5  ;;  %v1781_v48 = vld [vmem:[%s3365_s3 + $0x198] sm:$0xff]  ;;  %vm1974_vm10 = vcmp.gt.f32.partialorder %v1972_v45, 0.5 }
 0x766   :  { %2778 = vmatprep.subr.bf16.mxu1 %v2777_v55  ;;  %2784 = vmatpush3.bf16.msra.mxu0 %v2781_v5  ;;  %v1684_v5 = vld [vmem:[%s3365_s3 + $0x170] sm:$0xff] }
 0x767   :  { %2786 = vmatprep.subr.bf16.mxu0 %v2785_v8  ;;  %v2805_v7 = vpack.c.bf16 %v1685_v6, %v1684_v5 }
 0x769   :  { %2780 = vmatpush3.bf16.msra.mxu1 %v2777_v55 }
 0x76a   :  { %2788 = vmatpush3.bf16.msra.mxu0 %v2785_v8  ;;  %2790 = vmatprep.subr.bf16.mxu1 %v2789_v20  ;;  %v1686_v8 = vld [vmem:[%s3365_s3 + $0x180] sm:$0xff] }
 0x76b   :  { %2794 = vmatprep.subr.bf16.mxu0 %v2793_v32 }
 0x7c4   :  { %v984_v49 = vpop.f32.mrb[10].mxu1 }
 0x7c5   :  { %v2593_v50 = vpop.f32.mrb[11].mxu1 }
 0x7c8   :  { %v1054_v51 = vpop.f32.mrb[12].mxu1 }
 0x7c9   :  { %v2598_v52 = vpop.f32.mrb[13].mxu1 }
 0x7ca   :  { %v2356_v52 = vld [vmem:[%s3365_s3 + $0x150] ss:$0 sm:$0xff] }
 0x836   :  { %v1202_v56 = vpop.f32.mrb[10].mxu0 }
 0x837   :  { %1210 = vrot.lane.b32.xlu1 %v1202_v56, %s2885_s1  ;;  %v1128_v57 = vpop.f32.mrb[14].mxu1  ;;  %v2608_v58 = vpop.f32.mrb[11].mxu0 }
 0x838   :  { %1208 = vrot.lane.b32.xlu0 %v1128_v57, %s2885_s1  ;;  %v2603_v59 = vpop.f32.mrb[15].mxu1 }
 0x8a9   :  { %v1211_v60 = vpop.permute.xlu1 %1210 }
 0x8aa   :  { %v1215_v61 = vsel %vm721_vm8, %v1054_v51, %v1211_v60  ;;  %v1209_v63 = vpop.permute.xlu0 %1208  ;;  %v2886_v51 = vmov 0.0|0.0  }
 0x8ab   :  { %v1214_v0 = vsel %vm721_vm8, %v984_v49, %v1209_v63  ;;  %v1217_v2 = vadd.f32 %v1215_v61, %v3112_v27  ;;  %v1782_v49 = vld [vmem:[%s3365_s3 + $0x1a0] sm:$0xff] }
 0x8ac   :  { %v1216_v1 = vadd.f32 %v1214_v0, %v3106_v24  ;;  %v2814_v50 = vpack.c.bf16 %v1782_v49, %v1781_v48 }
 0x8ae   :  { %2617 = vmatprep.mubr.msk.f32.mxu1 %vm228_vm5, %v1216_v1 }
 0x8af   :  { %2618 = vmatmul.mubr.msk.f32.vlgmr.msra.gmra.mrb[16].mxu1 %vm228_vm5, %v1217_v2 }
 0x8b0   :  { %2792 = vmatpush3.bf16.msra.mxu1 %v2789_v20  ;;  %v2359_v20 = vld [vmem:[%s3365_s3 + $0x168] ss:$0 sm:$0xff] }
 0x8b1   :  { %2802 = vmatprep.subr.bf16.mxu1 %v2801_v47 }
 0x982   :  { %v2619_v10 = vpop.f32.mrb[16].mxu1 }
 0x983   :  { %v1305_v11 = vadd.f32 %v2619_v10, %v2347_v9  ;;  %v1299_v12 = vpop.f32.mrb[17].mxu1 }
 0x984   :  { %v1300_v13 = vadd.f32 %v2347_v9, %v1299_v12  ;;  %v1687_v9 = vld [vmem:[%s3365_s3 + $0x188] sm:$0xff]  ;;  %v1860_v12 = vld [vmem:[%s3365_s3 + $0x1b8] sm:$0xff] }
 0x985   :  { %v1309_v14 = vmul.f32 0.01, %v1305_v11  ;;  %v2809_v10 = vpack.c.bf16 %v1687_v9, %v1686_v8 }
 0x986   :  { %v1308_v15 = vmul.f32 0.01, %v1300_v13 }
 0x987   :  { %v1311_v17 = vmax.f32 %v1305_v11, %v1309_v14  ;;  %v1859_v11 = vld [vmem:[%s3365_s3 + $0x1b0] sm:$0xff]  ;;  %v1861_v14 = vld [vmem:[%s3365_s3 + $0x1c0] sm:$0xff] }
 0x988   :  { %v1310_v16 = vmax.f32 %v1300_v13, %v1308_v15  ;;  %v2817_v13 = vpack.c.bf16 %v1860_v12, %v1859_v11  ;;  %v1862_v15 = vld [vmem:[%s3365_s3 + $0x1c8] sm:$0xff] }
 0x98a   :  { %2628 = vmatprep.mubr.msk.f32.mxu0 %vm228_vm5, %v1310_v16  ;;  %v2820_v16 = vpack.c.bf16 %v1862_v15, %v1861_v14 }
 0x98b   :  { %2629 = vmatmul.mubr.msk.f32.vlgmr.msra.gmra.mrb[12].mxu0 %vm228_vm5, %v1311_v17 }
 0x98c   :  { %2796 = vmatpush3.bf16.msra.mxu0 %v2793_v32  ;;  %v1783_v32 = vld [vmem:[%s3365_s3 + $0x1a8] sm:$0x1] }
 0x98d   :  { %2798 = vmatprep.subr.bf16.mxu0 %v2797_v35 }
 0x990   :  { %2800 = vmatpush3.bf16.msra.mxu0 %v2797_v35 }
 0x991   :  { %2813 = vmatprep.subr.bf16.mxu0 %v2886_v51 }
 0xa5e   :  { %v2630_v22 = vpop.f32.mrb[12].mxu0 }
 0xa5f   :  { %v1399_v23 = vadd.f32 %v2630_v22, %v2350_v21  ;;  %v1393_v24 = vpop.f32.mrb[13].mxu0 }
 0xa60   :  { %v1394_v25 = vadd.f32 %v2350_v21, %v1393_v24 }
 0xa61   :  { %v1403_v26 = vmul.f32 0.01, %v1399_v23 }
 0xa62   :  { %v1402_v27 = vmul.f32 0.01, %v1394_v25 }
 0xa63   :  { %v1405_v29 = vmax.f32 %v1399_v23, %v1403_v26 }
 0xa64   :  { %v1404_v28 = vmax.f32 %v1394_v25, %v1402_v27 }
 0xa66   :  { %2635 = vmatprep.mubr.msk.f32.mxu1 %vm721_vm8, %v1404_v28 }
 0xa67   :  { %2636 = vmatmul.mubr.msk.f32.vlgmr.msra.gmra.mrb[18].mxu1 %vm721_vm8, %v1405_v29 }
 0xa68   :  { %2804 = vmatpush3.bf16.msra.mxu1 %v2801_v47 }
 0xa69   :  { %2806 = vmatprep.subr.bf16.mxu1 %v2805_v7 }
 0xb3a   :  { %v2637_v37 = vpop.f32.mrb[18].mxu1 }
 0xb3b   :  { %v1491_v38 = vadd.f32 %v2637_v37, %v2353_v36  ;;  %v1485_v39 = vpop.f32.mrb[19].mxu1 }
 0xb3c   :  { %v1486_v40 = vadd.f32 %v2353_v36, %v1485_v39  ;;  %v2362_v39 = vld [vmem:[%s3365_s3 + $0x190] ss:$0 sm:$0xff] }
 0xb3d   :  { %v1495_v41 = vmul.f32 0.01, %v1491_v38 }
 0xb3e   :  { %v1494_v42 = vmul.f32 0.01, %v1486_v40 }
 0xb3f   :  { %v1497_v44 = vmax.f32 %v1491_v38, %v1495_v41 }
 0xb40   :  { %v1496_v43 = vmax.f32 %v1486_v40, %v1494_v42 }
 0xb42   :  { %2646 = vmatprep.mubr.msk.f32.mxu0 %vm228_vm5, %v1496_v43  ;;  %v1971_v43 = vld [vmem:[%s3368_s2] sm:$0xff] }
 0xb43   :  { %2647 = vmatmul.mubr.msk.f32.vlgmr.msra.gmra.mrb[14].mxu0 %vm228_vm5, %v1497_v44  ;;  %vm1973_vm9 = vcmp.gt.f32.partialorder %v1971_v43, 0.5 }
 0xb44   :  { %2671 = vmatprep.mubr.msk.f32.mxu0 %vm2883_vm6, %v2882_v62  ;;  %2815 = vmatpush3.bf16.msra.mxu0 %v2814_v50 }
 0xb45   :  { %2816 = vmatprep.subr.bf16.mxu0 %v2886_v51 }
 0xc16   :  { %v2648_v53 = vpop.f32.mrb[14].mxu0 }
 0xc17   :  { %v1585_v54 = vadd.f32 %v2648_v53, %v2356_v52  ;;  %v1579_v55 = vpop.f32.mrb[15].mxu0 }
 0xc18   :  { %v1580_v56 = vadd.f32 %v2356_v52, %v1579_v55  ;;  %v1863_v52 = vld [vmem:[%s3365_s3 + $0x1d0] sm:$0x1] }
 0xc19   :  { %v1589_v57 = vmul.f32 0.01, %v1585_v54 }
 0xc1a   :  { %v1588_v58 = vmul.f32 0.01, %v1580_v56 }
 0xc1b   :  { %v1591_v60 = vmax.f32 %v1585_v54, %v1589_v57 }
 0xc1c   :  { %v1590_v59 = vmax.f32 %v1580_v56, %v1588_v58 }
 0xc1d   :  { %v2047_v17 = vsel %vm721_vm8, %v1591_v60, 0.0 }
 0xc1e   :  { %v1774_v61 = vsel %vm721_vm8, %v1590_v59, 0.0  ;;  %2653 = vmatprep.mubr.msk.f32.mxu1 %vm721_vm8, %v1590_v59  ;;  %v2048_v18 = vrot.slane %v2047_v17, 4 }
 0xc1f   :  { %v1775_v63 = vrot.slane %v1774_v61, 4  ;;  %2654 = vmatmul.mubr.msk.f32.vlgmr.msra.gmra.mrb[20].mxu1 %vm721_vm8, %v1591_v60 }
 0xc20   :  { %2808 = vmatpush3.bf16.msra.mxu1 %v2805_v7  ;;  %v2049_v19 = vadd.f32 %v2048_v18, %v2047_v17 }
 0xc21   :  { %v1776_v0 = vadd.f32 %v1775_v63, %v1774_v61  ;;  %2810 = vmatprep.subr.bf16.mxu1 %v2809_v10 }
 0xc22   :  { %v2050_v21 = vrot.slane %v2049_v19, 2 }
 0xc23   :  { %v1777_v1 = vrot.slane %v1776_v0, 2 }
 0xc24   :  { %2812 = vmatpush3.bf16.msra.mxu1 %v2809_v10  ;;  %v2051_v26 = vadd.f32 %v2050_v21, %v2049_v19 }
 0xc25   :  { %v1778_v2 = vadd.f32 %v1777_v1, %v1776_v0  ;;  %2822 = vmatprep.subr.bf16.mxu1 %v2886_v51 }
 0xc26   :  { %v2052_v30 = vrot.slane %v2051_v26, 1 }
 0xc27   :  { %v1779_v3 = vrot.slane %v1778_v2, 1 }
 0xc28   :  { %v2053_v33 = vadd.f32 %v2052_v30, %v2051_v26 }
 0xc29   :  { %v1780_v4 = vadd.f32 %v1779_v3, %v1778_v2 }
 0xc2b   :  { %2672 = vmatmul.mubr.msk.f32.vlgmr.msra.gmra.mrb[16].mxu0 %vm721_vm8, %v1780_v4 }
 0xc2c   :  { %2682 = vmatprep.mubr.msk.f32.mxu0 %vm2883_vm6, %v2882_v62  ;;  %2818 = vmatpush3.bf16.msra.mxu0 %v2817_v13 }
 0xc2d   :  { %2819 = vmatprep.subr.bf16.mxu0 %v2886_v51 }
 0xc30   :  { %2821 = vmatpush3.bf16.msra.mxu0 %v2820_v16 }
 0xcf2   :  { %v2655_v22 = vpop.f32.mrb[20].mxu1 }
 0xcf3   :  { %v1677_v23 = vadd.f32 %v2655_v22, %v2359_v20  ;;  %v1671_v24 = vpop.f32.mrb[21].mxu1 }
 0xcf4   :  { %v1672_v25 = vadd.f32 %v2359_v20, %v1671_v24 }
 0xcf5   :  { %v1681_v27 = vmul.f32 0.01, %v1677_v23 }
 0xcf6   :  { %v1680_v28 = vmul.f32 0.01, %v1672_v25 }
 0xcf7   :  { %v1683_v31 = vmax.f32 %v1677_v23, %v1681_v27 }
 0xcf8   :  { %v1682_v29 = vmax.f32 %v1672_v25, %v1680_v28 }
 0xcfa   :  { %2664 = vmatprep.mubr.msk.f32.mxu1 %vm228_vm5, %v1682_v29 }
 0xcfb   :  { %2665 = vmatmul.mubr.msk.f32.vlgmr.msra.gmra.mrb[22].mxu1 %vm228_vm5, %v1683_v31 }
 0xcfc   :  { %2824 = vmatpush3.bf16.msra.mxu1 %v2814_v50  ;;  %2689 = vmatprep.mubr.msk.f32.mxu1 %vm2883_vm6, %v2882_v62  ;;  %v2887_v50 = vmov -103.616325  }
 0xcfd   :  { %2825 = vmatprep.subr.bf16.mxu1 %v2886_v51  ;;  %v1976_v55 = vsel %vm1974_vm10, 0.0, %v2887_v50 }
 0xcfe   :  { %v1853_v34 = vpop.f32.mrb[16].mxu0 }
 0xcff   :  { %v1854_v35 = vadd.f32 %v1853_v34, %v1783_v32  ;;  %v2673_v36 = vpop.f32.mrb[17].mxu0  ;;  %2690 = vmatmul.mubr.msk.f32.vlgmr.msra.gmra.mrb[24].mxu1 %vm721_vm8, %v2053_v33 }
 0xd00   :  { %2827 = vmatpush3.bf16.msra.mxu1 %v2817_v13  ;;  %2700 = vmatprep.mubr.msk.f32.mxu1 %vm2883_vm6, %v2882_v62  ;;  %v2056_v62 = vld [vmem:[%s3365_s3 + $0x1a8] sm:$0x1] }
 0xd01   :  { %v1857_v37 = vmul.f32 0.01, %v1854_v35  ;;  %2828 = vmatprep.subr.bf16.mxu1 %v2886_v51  ;;  %v1975_v51 = vsel %vm1973_vm9, 0.0, %v2887_v50 }
 0xd03   :  { %v1858_v38 = vmax.f32 %v1854_v35, %v1857_v37 }
 0xd04   :  { %2830 = vmatpush3.bf16.msra.mxu1 %v2820_v16 }
 0xd05   :  { %2683 = vmatmul.mubr.msk.f32.vlgmr.msra.gmra.mrb[18].mxu0 %vm228_vm5, %v1858_v38 }
 0xdce   :  { %v2666_v40 = vpop.f32.mrb[22].mxu1 }
 0xdcf   :  { %v3278_v41 = vadd.f32 %v2666_v40, %v2362_v39  ;;  %v1765_v42 = vpop.f32.mrb[23].mxu1 }
 0xdd0   :  { %v1766_v48 = vadd.f32 %v2362_v39, %v1765_v42 }
 0xdd2   :  { %v2126_v44 = vpop.f32.mrb[24].mxu1  ;;  %v1977_v56 = vadd.f32 %v1975_v51, %v1766_v48  ;;  %v1938_v59 = vsel %vm1937_vm11, %v1766_v48, -inf }
 0xdd3   :  { %v2127_v46 = vadd.f32 %v2126_v44, %v2056_v62  ;;  %v2691_v47 = vpop.f32.mrb[25].mxu1 }
 0xdd4   :  { %v1979_v0 = vsel %vm1937_vm11, %v1977_v56, -inf }
 0xdd5   :  { %v2130_v49 = vmul.f32 0.01, %v2127_v46 }
 0xdd7   :  { %v2131_v53 = vmax.f32 %v2127_v46, %v2130_v49 }
 0xdd8   :  { %v1933_v54 = vpop.f32.mrb[18].mxu0 }
 0xdd9   :  { %v1934_v57 = vadd.f32 %v1933_v54, %v1863_v52  ;;  %v2684_v58 = vpop.f32.mrb[19].mxu0  ;;  %2701 = vmatmul.mubr.msk.f32.vlgmr.msra.gmra.mrb[26].mxu1 %vm228_vm5, %v2131_v53 }
 0xddb   :  { %v1940_v60 = vsel %vm1939_vm12, %v1934_v57, -inf  ;;  %v1978_v61 = vadd.f32 %v1976_v55, %v1934_v57 }
 0xddc   :  { %v1941_v63 = vmax.f32 %v1938_v59, %v1940_v60 }
 0xddd   :  { %v1980_v1 = vsel %vm1939_vm12, %v1978_v61, -inf }
 0xdde   :  { %v1942_v2 = vrot.slane %v1941_v63, 4  ;;  %v1981_v3 = vmax.f32 %v1979_v0, %v1980_v1 }
 0xde0   :  { %v1943_v4 = vmax.f32 %v1941_v63, %v1942_v2  ;;  %v1982_v5 = vrot.slane %v1981_v3, 4 }
 0xde2   :  { %v1944_v6 = vrot.slane %v1943_v4, 2  ;;  %v1983_v7 = vmax.f32 %v1981_v3, %v1982_v5 }
 0xde4   :  { %v1945_v8 = vmax.f32 %v1943_v4, %v1944_v6  ;;  %v1984_v9 = vrot.slane %v1983_v7, 2 }
 0xde6   :  { %v1946_v10 = vrot.slane %v1945_v8, 1  ;;  %v1985_v11 = vmax.f32 %v1983_v7, %v1984_v9 }
 0xde8   :  { %v1947_v12 = vmax.f32 %v1945_v8, %v1946_v10  ;;  %v1986_v13 = vrot.slane %v1985_v11, 1 }
 0xdea   :  { %v1948_v14 = vsub.f32 %v1766_v48, %v1947_v12  ;;  %v1949_v15 = vsub.f32 %v1934_v57, %v1947_v12  ;;  %v1987_v16 = vmax.f32 %v1985_v11, %v1986_v13  ;;  %v2369_v11 = vld [vmem:[%s3368_s2 + $0x10] sm:$0xff]  ;;  %v2370_v12 = vld [vmem:[%s3368_s2 + $0x18] sm:$0x1] }
 0xdeb   :  { %vm2245_vm1 = vcmp.gt.f32.partialorder %v2369_v11, 0.5  ;;  %vm2246_vm2 = vcmp.gt.f32.partialorder %v2370_v12, 0.5 }
 0xdec   :  { %v1950_v17 = vmul.f32 1.442695, %v1948_v14  ;;  %v1952_v18 = vmul.f32 1.442695, %v1949_v15  ;;  %v1988_v19 = vsub.f32 %v1977_v56, %v1987_v16  ;;  %v1989_v20 = vsub.f32 %v1978_v61, %v1987_v16 }
 0xded   :  { %v2247_v13 = vsel %vm2245_vm1, 0.0, %v2887_v50  ;;  %v2248_v16 = vsel %vm2246_vm2, 0.0, %v2887_v50 }
 0xdee   :  { %2841 = vpow2.f32 %v1950_v17  ;;  %v1990_v21 = vmul.f32 1.442695, %v1988_v19  ;;  %v1992_v22 = vmul.f32 1.442695, %v1989_v20  ;;  %v2249_v17 = vadd.f32 %v2247_v13, %v3278_v41 }
 0xdef   :  { %2843 = vpow2.f32 %v1952_v18 }
 0xdf0   :  { %2845 = vpow2.f32 %v1990_v21 }
 0xdf1   :  { %2847 = vpow2.f32 %v1992_v22 }
 0xdf8   :  { %v2842_v23 = vpop.eup %2841 }
 0xdf9   :  { %v2844_v24 = vpop.eup %2843  ;;  %v1954_v25 = vsel %vm1937_vm11, %v2842_v23, 0.0 }
 0xdfa   :  { %v2846_v26 = vpop.eup %2845  ;;  %v1955_v27 = vsel %vm1939_vm12, %v2844_v24, 0.0  ;;  %v2251_v24 = vsel %vm1937_vm11, %v2249_v17, -inf }
 0xdfb   :  { %v2848_v28 = vpop.eup %2847  ;;  %v1956_v29 = vadd.f32 %v1955_v27, %v1954_v25  ;;  %v1994_v30 = vsel %vm1937_vm11, %v2846_v26, 0.0 }
 0xdfc   :  { %v1995_v31 = vsel %vm1939_vm12, %v2848_v28, 0.0 }
 0xdfd   :  { %v1957_v32 = vrot.slane %v1956_v29, 4  ;;  %v1996_v33 = vadd.f32 %v1995_v31, %v1994_v30 }
 0xdff   :  { %v1958_v34 = vadd.f32 %v1957_v32, %v1956_v29  ;;  %v1997_v35 = vrot.slane %v1996_v33, 4 }
 0xe01   :  { %v1959_v36 = vrot.slane %v1958_v34, 2  ;;  %v1998_v37 = vadd.f32 %v1997_v35, %v1996_v33 }
 0xe03   :  { %v1960_v38 = vadd.f32 %v1959_v36, %v1958_v34  ;;  %v1999_v39 = vrot.slane %v1998_v37, 2 }
 0xe05   :  { %v1961_v40 = vrot.slane %v1960_v38, 1  ;;  %v2000_v42 = vadd.f32 %v1999_v39, %v1998_v37 }
 0xe07   :  { %v1962_v43 = vadd.f32 %v1961_v40, %v1960_v38  ;;  %v2001_v62 = vrot.slane %v2000_v42, 1 }
 0xe09   :  { %2849 = vlog2.f32 %v1962_v43  ;;  %v2002_v44 = vadd.f32 %v2001_v62, %v2000_v42 }
 0xe0b   :  { %2851 = vlog2.f32 %v2002_v44 }
 0xe13   :  { %v2850_v45 = vpop.eup %2849 }
 0xe14   :  { %v1964_v46 = vmul.f32 0.6931472, %v2850_v45 }
 0xe15   :  { %v2852_v47 = vpop.eup %2851 }
 0xe16   :  { %v1965_v48 = vsub.f32 %v1948_v14, %v1964_v46  ;;  %v1966_v49 = vsub.f32 %v1949_v15, %v1964_v46  ;;  %v2004_v51 = vmul.f32 0.6931472, %v2852_v47  ;;  %v2136_v14 = vld [vmem:[%s3365_s3 + $0x1d0] sm:$0x1] }
 0xe18   :  { %v1967_v52 = vmul.f32 1.442695, %v1965_v48  ;;  %v1969_v53 = vmul.f32 1.442695, %v1966_v49  ;;  %v2006_v54 = vsub.f32 %v1989_v20, %v2004_v51  ;;  %v2005_v55 = vsub.f32 %v1988_v19, %v2004_v51 }
 0xe19   :  { %v2210_v20 = vsel %vm1937_vm11, %v3278_v41, -inf }
 0xe1a   :  { %2853 = vpow2.f32 %v1967_v52  ;;  %2023 = vrot.lane.b32.xlu1 %v2006_v54, %s2888_s17  ;;  %2021 = vrot.lane.b32.xlu0 %v2005_v55, %s2888_s17  ;;  %v2007_v56 = vmul.f32 1.442695, %v2005_v55  ;;  %v2009_v57 = vmul.f32 1.442695, %v2006_v54 }
 0xe1b   :  { %2855 = vpow2.f32 %v1969_v53 }
 0xe1c   :  { %2857 = vpow2.f32 %v2007_v56 }
 0xe1d   :  { %2859 = vpow2.f32 %v2009_v57 }
 0xe24   :  { %v2854_v58 = vpop.eup %2853 }
 0xe25   :  { %v2856_v59 = vpop.eup %2855  ;;  %2013 = vrot.lane.b32.xlu0 %v2854_v58, %s2889_s18 }
 0xe26   :  { %2015 = vrot.lane.b32.xlu1 %v2856_v59, %s2889_s18  ;;  %v2858_v60 = vpop.eup %2857 }
 0xe27   :  { %v2860_v61 = vpop.eup %2859 }
 0xe29   :  { %2029 = vrot.lane.b32.xlu0 %v2858_v60, %s2890_s19 }
 0xe2a   :  { %2031 = vrot.lane.b32.xlu1 %v2860_v61, %s2890_s19 }
 0xe8c   :  { %v2022_v63 = vpop.permute.xlu0 %2021  ;;  %v2024_v0 = vpop.permute.xlu1 %2023 }
 0xe97   :  { %v2014_v1 = vpop.permute.xlu0 %2013 }
 0xe98   :  { %v2016_v2 = vpop.permute.xlu1 %2015  ;;  %v2035_v3 = vsel %vm1937_vm11, %v1965_v48, %v2014_v1 }
 0xe99   :  { %v2036_v4 = vsel %vm1937_vm11, %v1966_v49, %v2016_v2  ;;  %v2038_v5 = vsel %vm2037_vm13, %v2035_v3, %v2022_v63 }
 0xe9a   :  { %v2039_v7 = vsel %vm2037_vm13, %v2036_v4, %v2024_v0 }
 0xe9b   :  { %v2030_v6 = vpop.permute.xlu0 %2029 }
 0xe9c   :  { %v2032_v8 = vpop.permute.xlu1 %2031  ;;  %v2041_v9 = vsel %vm2040_vm14, %v2038_v5, %v2030_v6 }
 0xe9d   :  { %v2042_v10 = vsel %vm2040_vm14, %v2039_v7, %v2032_v8  ;;  %2044 = vst.msk [vmem:[%s3369_s4] sm:$0xff] %vm2043_vm15, %v2041_v9 }
 0xe9e   :  { %2046 = vst.msk [vmem:[%s3369_s4 + $0x8] sm:$0x1] %vm2045_vm0, %v2042_v10 }
 0xeac   :  { %v2206_v15 = vpop.f32.mrb[26].mxu1 }
 0xead   :  { %v2207_v18 = vadd.f32 %v2206_v15, %v2136_v14  ;;  %v2702_v19 = vpop.f32.mrb[27].mxu1 }
 0xeaf   :  { %v2211_v21 = vsel %vm1939_vm12, %v2207_v18, -inf  ;;  %v2250_v22 = vadd.f32 %v2248_v16, %v2207_v18 }
 0xeb0   :  { %v2212_v23 = vmax.f32 %v2210_v20, %v2211_v21 }
 0xeb1   :  { %v2252_v25 = vsel %vm1939_vm12, %v2250_v22, -inf }
 0xeb2   :  { %v2213_v26 = vrot.slane %v2212_v23, 4  ;;  %v2253_v27 = vmax.f32 %v2251_v24, %v2252_v25 }
 0xeb4   :  { %v2214_v28 = vmax.f32 %v2212_v23, %v2213_v26  ;;  %v2254_v29 = vrot.slane %v2253_v27, 4 }
 0xeb6   :  { %v2215_v50 = vrot.slane %v2214_v28, 2  ;;  %v2255_v30 = vmax.f32 %v2253_v27, %v2254_v29 }
 0xeb8   :  { %v2216_v31 = vmax.f32 %v2214_v28, %v2215_v50  ;;  %v2256_v32 = vrot.slane %v2255_v30, 2 }
 0xeba   :  { %v2217_v33 = vrot.slane %v2216_v31, 1  ;;  %v2257_v34 = vmax.f32 %v2255_v30, %v2256_v32 }
 0xebc   :  { %v2218_v35 = vmax.f32 %v2216_v31, %v2217_v33  ;;  %v2258_v36 = vrot.slane %v2257_v34, 1 }
 0xebe   :  { %v2219_v37 = vsub.f32 %v3278_v41, %v2218_v35  ;;  %v2220_v38 = vsub.f32 %v2207_v18, %v2218_v35  ;;  %v2259_v39 = vmax.f32 %v2257_v34, %v2258_v36 }
 0xec0   :  { %v2221_v40 = vmul.f32 1.442695, %v2219_v37  ;;  %v2223_v42 = vmul.f32 1.442695, %v2220_v38  ;;  %v2260_v43 = vsub.f32 %v2249_v17, %v2259_v39  ;;  %v2261_v62 = vsub.f32 %v2250_v22, %v2259_v39 }
 0xec2   :  { %2861 = vpow2.f32 %v2221_v40  ;;  %v2262_v44 = vmul.f32 1.442695, %v2260_v43  ;;  %v2264_v45 = vmul.f32 1.442695, %v2261_v62 }
 0xec3   :  { %2863 = vpow2.f32 %v2223_v42 }
 0xec4   :  { %2865 = vpow2.f32 %v2262_v44 }
 0xec5   :  { %2867 = vpow2.f32 %v2264_v45 }
 0xecc   :  { %v2862_v46 = vpop.eup %2861 }
 0xecd   :  { %v2864_v47 = vpop.eup %2863  ;;  %v2225_v48 = vsel %vm1937_vm11, %v2862_v46, 0.0 }
 0xece   :  { %v2866_v49 = vpop.eup %2865  ;;  %v2226_v51 = vsel %vm1939_vm12, %v2864_v47, 0.0 }
 0xecf   :  { %v2868_v41 = vpop.eup %2867  ;;  %v2227_v52 = vadd.f32 %v2226_v51, %v2225_v48  ;;  %v2266_v53 = vsel %vm1937_vm11, %v2866_v49, 0.0 }
 0xed0   :  { %v2267_v54 = vsel %vm1939_vm12, %v2868_v41, 0.0 }
 0xed1   :  { %v2228_v55 = vrot.slane %v2227_v52, 4  ;;  %v2268_v56 = vadd.f32 %v2267_v54, %v2266_v53 }
 0xed3   :  { %v2229_v57 = vadd.f32 %v2228_v55, %v2227_v52  ;;  %v2269_v58 = vrot.slane %v2268_v56, 4 }
 0xed5   :  { %v2230_v59 = vrot.slane %v2229_v57, 2  ;;  %v2270_v60 = vadd.f32 %v2269_v58, %v2268_v56 }
 0xed7   :  { %v2231_v61 = vadd.f32 %v2230_v59, %v2229_v57  ;;  %v2271_v63 = vrot.slane %v2270_v60, 2 }
 0xed9   :  { %v2232_v0 = vrot.slane %v2231_v61, 1  ;;  %v2272_v1 = vadd.f32 %v2271_v63, %v2270_v60 }
 0xedb   :  { %v2233_v2 = vadd.f32 %v2232_v0, %v2231_v61  ;;  %v2273_v3 = vrot.slane %v2272_v1, 1 }
 0xedd   :  { %2869 = vlog2.f32 %v2233_v2  ;;  %v2274_v4 = vadd.f32 %v2273_v3, %v2272_v1 }
 0xedf   :  { %2871 = vlog2.f32 %v2274_v4 }
 0xee7   :  { %v2870_v5 = vpop.eup %2869 }
 0xee8   :  { %v2235_v6 = vmul.f32 0.6931472, %v2870_v5 }
 0xee9   :  { %v2872_v7 = vpop.eup %2871 }
 0xeea   :  { %v2236_v8 = vsub.f32 %v2219_v37, %v2235_v6  ;;  %v2237_v9 = vsub.f32 %v2220_v38, %v2235_v6  ;;  %v2276_v10 = vmul.f32 0.6931472, %v2872_v7 }
 0xeec   :  { %v2238_v11 = vmul.f32 1.442695, %v2236_v8  ;;  %v2240_v12 = vmul.f32 1.442695, %v2237_v9  ;;  %v2278_v13 = vsub.f32 %v2261_v62, %v2276_v10  ;;  %v2277_v14 = vsub.f32 %v2260_v43, %v2276_v10 }
 0xeee   :  { %2873 = vpow2.f32 %v2238_v11  ;;  %2295 = vrot.lane.b32.xlu1 %v2278_v13, %s2888_s17  ;;  %v2279_v15 = vmul.f32 1.442695, %v2277_v14  ;;  %2293 = vrot.lane.b32.xlu0 %v2277_v14, %s2888_s17  ;;  %v2281_v16 = vmul.f32 1.442695, %v2278_v13 }
 0xeef   :  { %2875 = vpow2.f32 %v2240_v12 }
 0xef0   :  { %2877 = vpow2.f32 %v2279_v15 }
 0xef1   :  { %2879 = vpow2.f32 %v2281_v16 }
 0xef8   :  { %v2874_v17 = vpop.eup %2873 }
 0xef9   :  { %v2876_v18 = vpop.eup %2875  ;;  %2285 = vrot.lane.b32.xlu0 %v2874_v17, %s2889_s18 }
 0xefa   :  { %2287 = vrot.lane.b32.xlu1 %v2876_v18, %s2889_s18  ;;  %v2878_v19 = vpop.eup %2877 }
 0xefb   :  { %v2880_v20 = vpop.eup %2879 }
 0xefd   :  { %2301 = vrot.lane.b32.xlu0 %v2878_v19, %s2890_s19 }
 0xefe   :  { %2303 = vrot.lane.b32.xlu1 %v2880_v20, %s2890_s19 }
 0xf60   :  { %v2294_v21 = vpop.permute.xlu0 %2293  ;;  %v2296_v22 = vpop.permute.xlu1 %2295 }
 0xf6b   :  { %v2286_v23 = vpop.permute.xlu0 %2285 }
 0xf6c   :  { %v2288_v24 = vpop.permute.xlu1 %2287  ;;  %v2307_v25 = vsel %vm1937_vm11, %v2236_v8, %v2286_v23 }
 0xf6d   :  { %v2308_v26 = vsel %vm1937_vm11, %v2237_v9, %v2288_v24  ;;  %v2309_v27 = vsel %vm2037_vm13, %v2307_v25, %v2294_v21 }
 0xf6e   :  { %v2310_v29 = vsel %vm2037_vm13, %v2308_v26, %v2296_v22 }
 0xf6f   :  { %v2302_v28 = vpop.permute.xlu0 %2301 }
 0xf70   :  { %v2304_v50 = vpop.permute.xlu1 %2303  ;;  %v2311_v30 = vsel %vm2040_vm14, %v2309_v27, %v2302_v28 }
 0xf71   :  { %v2312_v31 = vsel %vm2040_vm14, %v2310_v29, %v2304_v50  ;;  %2371 = vst.msk [vmem:[%s3369_s4 + $0x10] sm:$0xff] %vm2043_vm15, %v2311_v30 }
 0xf72   :  { %2372 = vst.msk [vmem:[%s3369_s4 + $0x18] sm:$0x1] %vm2045_vm0, %v2312_v31 }

</bundles_post_ra>
